<compile_context>
chip_gen: v5e
topology: v5e:2x2
jax: 0.10.0
libtpu: 0.0.40
codegen_flags: <defaults>
</compile_context>

<pallas_src>
import functools

import jax
import jax.numpy as jnp
from jax import lax
from jax.experimental import pallas as pl
from jax.experimental.pallas import tpu as pltpu


class Args:
    # deterministic "hyper-parameters" matching the module's expectations
    reconstruction = (1.0, 0.5, 0.5)
    regression = 2.0
    physics = 0.1
    independence = 0.01
    variance = 0.005


# ----------------------------------------------------------------------------
# Fused kernel: all WEIGHTED loss components + total -> 6 SMEM scalars
#   out[0] total           out[1] recon_loss         out[2] pollution_loss
#   out[3] physics_loss    out[4] feature_indep_loss out[5] variance_loss
# ----------------------------------------------------------------------------
def _guided_loss_kernel(args, pp_ref, pt_ref, rx_ref, x_ref, h_ref, out_ref):
    rx = rx_ref[...].astype(jnp.float32)      # [B, 3, L] native layout
    x = x_ref[...].astype(jnp.float32)        # [B, 3, L]
    B, C, L = x.shape
    inv_bl = jnp.float32(1.0 / (B * L))

    # --- reconstruction MSE: weights baked in, single elementwise pass + one reduce ---
    d = rx - x                                # reused by the physics terms
    d2 = d * d
    w0, w1, w2 = (jnp.float32(w) for w in args.reconstruction)
    ch = lax.broadcasted_iota(jnp.int32, (B, C, L), 1)
    ch_w = jnp.where(ch == 0, w0, jnp.where(ch == 1, w1, w2))
    recon = jnp.sum(d2 * ch_w) * inv_bl

    # --- pollution MSE: B scalars in SMEM, scalar-unit only ---
    nb = pp_ref.shape[0]
    acc = jnp.float32(0.0)
    for i in range(nb):                       # static, tiny B -> unrolled
        dd = pp_ref[i] - pt_ref[i]
        acc = acc + dd * dd
    pollution = jnp.float32(args.regression) * acc / jnp.float32(nb)

    total = recon + pollution

    # --- physics terms: |r*w - x*w| == |r - x| * w because w = 1+sigmoid > 0 ---
    physics = jnp.float32(0.0)
    if args.physics > 0:
        x0 = x[:, 0:1, :8]                                        # [B,1,8]
        w_t = 1.0 + jax.nn.sigmoid(
            (x0[:, :, 1:] - x0[:, :, :-1]) + jnp.float32(abs(0.65 * 2.0)))
        temp_l = jnp.mean(jnp.abs(d[:, 0:1, 1:8]) * w_t)          # [B,1,7]

        u = x[:, 1:2, :6]
        v = x[:, 2:3, :6]
        wind = jnp.sqrt(u * u + v * v)                            # [B,1,6]
        w_w = 1.0 + jax.nn.sigmoid(jnp.abs(wind[:, :, 1:] - wind[:, :, :-1]))
        ru = rx[:, 1:2, 1:6]
        rv = rx[:, 2:3, 1:6]
        recon_wind = jnp.sqrt(ru * ru + rv * rv)                  # [B,1,5]
        wind_l = jnp.mean(jnp.abs(recon_wind - wind[:, :, 1:]) * w_w)

        physics = jnp.float32(args.physics) * (temp_l + wind_l)
        total = total + physics

    # --- hidden statistics (mean / centered shared by both regularizers) ---
    fi = jnp.float32(0.0)
    var_kl = jnp.float32(0.0)
    if args.independence > 0 or args.variance > 0:
        h = h_ref[...].astype(jnp.float32)                        # [B, H]
        hb, hh = h.shape
        mean = jnp.mean(h, axis=0, keepdims=True)                 # [1, H]
        centered = h - mean                                       # [B, H]

    if args.independence > 0:
        # cov = centered^T @ centered / B on the MXU, default precision.
        # TODO(synk): on v5e an explicit bf16 cast guarantees a one-pass MXU
        # matmul; skipped here to keep exact parity with the f32 reference.
        cov = lax.dot_general(
            centered, centered,
            dimension_numbers=(((0,), (0,)), ((), ())),
            preferred_element_type=jnp.float32,
        ) / jnp.float32(hb)                                       # [H, H]
        mn = jnp.min(cov, axis=0, keepdims=True)                  # [1, H]
        mx = jnp.max(cov, axis=0, keepdims=True)                  # [1, H]
        inv_rng = pl.reciprocal(mx - mn, approx=True)             # EUP, [1,H]
        normalized = (cov - mn) * inv_rng
        row = lax.broadcasted_iota(jnp.int32, (hh, hh), 0)
        col = lax.broadcasted_iota(jnp.int32, (hh, hh), 1)
        eye = (row == col).astype(jnp.float32)
        fi = jnp.float32(args.independence) * jnp.sum((normalized - eye) ** 2)
        total = total + fi

    if args.variance > 0:
        # torch.var / torch.std are unbiased (ddof=1)
        var = jnp.sum(centered * centered, axis=0, keepdims=True) / jnp.float32(hb - 1)
        target_mean = jnp.mean(mean)
        var_mean = jnp.mean(var)
        ts2 = jnp.sum((var - var_mean) ** 2) / jnp.float32(hh - 1)   # std(var)^2
        inv_ts2 = 1.0 / ts2
        v_over = var * inv_ts2                                     # reused twice
        kl = 0.5 * jnp.sum((mean - target_mean) ** 2 * inv_ts2
                           + v_over - 1.0 - jnp.log(v_over))
        var_kl = jnp.float32(args.variance) * kl
        total = total + var_kl

    out_ref[0] = total
    out_ref[1] = recon
    out_ref[2] = pollution
    out_ref[3] = physics
    out_ref[4] = fi
    out_ref[5] = var_kl


# ----------------------------------------------------------------------------
# Wrapper
# ----------------------------------------------------------------------------
_VMEM = pl.BlockSpec(memory_space=pltpu.MemorySpace.VMEM)
_SMEM = pl.BlockSpec(memory_space=pltpu.MemorySpace.SMEM)


def guided_loss(recon_x, x, pollution_pred, pollution_true, hidden, args=Args):
    """Returns (total_loss, losses). losses holds jnp scalars (no host syncs),
    keeping the function jit-able; convert at the call site if Python floats
    are needed (mirrors PyTorch's .item() for logging)."""
    # pollution values are a handful of scalars -> SMEM (astype is a no-op for f32)
    pp = jnp.reshape(pollution_pred, (-1,)).astype(jnp.float32)
    pt = jnp.reshape(pollution_true, (-1,)).astype(jnp.float32)

    out = pl.pallas_call(
        functools.partial(_guided_loss_kernel, args),
        out_shape=jax.ShapeDtypeStruct((6,), jnp.float32),
        in_specs=[_SMEM, _SMEM, _VMEM, _VMEM, _VMEM],
        out_specs=_SMEM,
    )(pp, pt, recon_x, x, hidden)

    losses = {'recon_loss': out[1], 'pollution_loss': out[2]}
    if args.physics > 0:
        losses['physics_loss'] = out[3]
    if args.independence > 0:
        losses['feature_independence_loss'] = out[4]
    if args.variance > 0:
        losses['variance_loss'] = out[5]
    return out[0], losses


# ----------------------------------------------------------------------------
# Pure-JAX reference (mirrors the PyTorch semantics) for a sanity check
# ----------------------------------------------------------------------------
def _reference(recon_x, x, pp, pt, hidden, args=Args):
    mse = lambda a, b: jnp.mean((a - b) ** 2)
    recon = (mse(recon_x[:, 0, :], x[:, 0, :]) * args.reconstruction[0]
             + mse(recon_x[:, 1, :], x[:, 1, :]) * args.reconstruction[1]
             + mse(recon_x[:, 2, :], x[:, 2, :]) * args.reconstruction[2])
    pollution = args.regression * mse(pp, pt)

    td = jnp.diff(x[:, 0, :8], axis=-1) + jnp.float32(abs(0.65 * 2.0))
    ta = jax.nn.sigmoid(td)
    temp_l = jnp.mean(jnp.abs(recon_x[:, 0, 1:8] * (1 + ta) - x[:, 0, 1:8] * (1 + ta)))
    u, v = x[:, 1, :6], x[:, 2, :6]
    wind = jnp.sqrt(u ** 2 + v ** 2)
    wa = jax.nn.sigmoid(jnp.abs(jnp.diff(wind, axis=-1)))
    rw = jnp.sqrt(recon_x[:, 1, :] ** 2 + recon_x[:, 2, :] ** 2)
    wind_l = jnp.mean(jnp.abs(rw[:, 1:6] * (1 + wa) - wind[:, 1:6] * (1 + wa)))
    physics = args.physics * temp_l + args.physics * wind_l

    mean = jnp.mean(hidden, axis=0)
    centered = hidden - mean
    cov = centered.T @ centered / hidden.shape[0]
    mn, mx = cov.min(axis=0), cov.max(axis=0)
    norm = (cov - mn) / (mx - mn)
    fi = args.independence * jnp.sum((norm - jnp.eye(cov.shape[0])) ** 2)

    var = jnp.var(hidden, axis=0, ddof=1)
    tm = jnp.mean(mean)
    ts = jnp.std(var, ddof=1)
    kl = 0.5 * jnp.sum((mean - tm) ** 2 / ts ** 2 + var / ts ** 2
                       - 1 - jnp.log(var / ts ** 2))
    vl = args.variance * kl

    total = recon + pollution + physics + fi + vl
    losses = {'recon_loss': recon, 'pollution_loss': pollution,
              'physics_loss': physics, 'feature_independence_loss': fi,
              'variance_loss': vl}
    return total, losses


if __name__ == "__main__":
    key = jax.random.PRNGKey(0)
    k1, k2, k3, k4, k5 = jax.random.split(key, 5)

    B, C, L, H = 8, 3, 16, 32
    x = jax.random.normal(k1, (B, C, L), dtype=jnp.float32)
    recon_x = x + 0.1 * jax.random.normal(k2, (B, C, L), dtype=jnp.float32)
    pollution_true = jax.random.normal(k3, (B, 1), dtype=jnp.float32)
    pollution_pred = pollution_true + 0.1 * jax.random.normal(k4, (B, 1), dtype=jnp.float32)
    hidden = jax.random.normal(k5, (B, H), dtype=jnp.float32)

    loss_fn = jax.jit(guided_loss)
    total, losses = loss_fn(recon_x, x, pollution_pred, pollution_true, hidden)
    total = jax.block_until_ready(total)

    ref_total, ref_losses = _reference(recon_x, x, pollution_pred,
                                       pollution_true, hidden)
    ref_total = jax.block_until_ready(ref_total)

    assert jnp.allclose(total, ref_total, rtol=2e-3, atol=1e-3), (
        float(total), float(ref_total))
    for name, val in ref_losses.items():
        assert jnp.allclose(losses[name], val, rtol=2e-3, atol=1e-3), (
            name, float(losses[name]), float(val))

    print("KERNEL_OK")
</pallas_src>

<mosaic_0001>
module attributes {stable_mosaic.version = 11 : i64} {
  func.func @_guided_loss_kernel(%arg0: memref<8xf32, #tpu.memory_space<smem>>, %arg1: memref<8xf32, #tpu.memory_space<smem>>, %arg2: memref<8x3x16xf32, #tpu.memory_space<vmem>>, %arg3: memref<8x3x16xf32, #tpu.memory_space<vmem>>, %arg4: memref<8x32xf32, #tpu.memory_space<vmem>>, %arg5: memref<6xf32, #tpu.memory_space<smem>>) attributes {dimension_semantics = [], scalar_prefetch = 0 : i64, scratch_operands = 0 : i64, tpu.core_type = #tpu.core_type<tc>} {
    %c0 = arith.constant 0 : index
    %c0_0 = arith.constant 0 : index
    %c0_1 = arith.constant 0 : index
    %0 = vector.load %arg2[%c0, %c0_0, %c0_1] : memref<8x3x16xf32, #tpu.memory_space<vmem>>, vector<8x3x16xf32>
    %c0_2 = arith.constant 0 : index
    %c0_3 = arith.constant 0 : index
    %c0_4 = arith.constant 0 : index
    %1 = vector.load %arg3[%c0_2, %c0_3, %c0_4] : memref<8x3x16xf32, #tpu.memory_space<vmem>>, vector<8x3x16xf32>
    %2 = arith.subf %0, %1 : vector<8x3x16xf32>
    %3 = arith.mulf %2, %2 : vector<8x3x16xf32>
    %4 = tpu.iota {dimensions = array<i32: 1>} : vector<8x3x16xi32>
    %c0_i32 = arith.constant 0 : i32
    %5 = vector.broadcast %c0_i32 : i32 to vector<8x3x16xi32>
    %6 = arith.cmpi eq, %4, %5 : vector<8x3x16xi32>
    %c1_i32 = arith.constant 1 : i32
    %7 = vector.broadcast %c1_i32 : i32 to vector<8x3x16xi32>
    %8 = arith.cmpi eq, %4, %7 : vector<8x3x16xi32>
    %cst = arith.constant 5.000000e-01 : f32
    %cst_5 = arith.constant 5.000000e-01 : f32
    %9 = vector.broadcast %cst : f32 to vector<8x3x16xf32>
    %10 = vector.broadcast %cst_5 : f32 to vector<8x3x16xf32>
    %11 = arith.select %8, %9, %10 : vector<8x3x16xi1>, vector<8x3x16xf32>
    %cst_6 = arith.constant 1.000000e+00 : f32
    %12 = vector.broadcast %cst_6 : f32 to vector<8x3x16xf32>
    %13 = arith.select %6, %12, %11 : vector<8x3x16xi1>, vector<8x3x16xf32>
    %14 = arith.mulf %3, %13 : vector<8x3x16xf32>
    %15 = vector.shape_cast %14 : vector<8x3x16xf32> to vector<1x8x3x16xf32>
    %cst_7 = arith.constant dense<0.000000e+00> : vector<1xf32>
    %16 = vector.multi_reduction <add>, %15, %cst_7 [1, 2, 3] : vector<1x8x3x16xf32> to vector<1xf32>
    %17 = vector.shape_cast %16 : vector<1xf32> to vector<1x1x1x1xf32>
    %18 = vector.extract %17[0, 0, 0, 0] : f32 from vector<1x1x1x1xf32>
    %cst_8 = arith.constant 7.812500e-03 : f32
    %19 = arith.mulf %18, %cst_8 : f32
    %c0_9 = arith.constant 0 : index
    %20 = memref.load %arg0[%c0_9] : memref<8xf32, #tpu.memory_space<smem>>
    %c0_10 = arith.constant 0 : index
    %21 = memref.load %arg1[%c0_10] : memref<8xf32, #tpu.memory_space<smem>>
    %22 = arith.subf %20, %21 : f32
    %23 = arith.mulf %22, %22 : f32
    %cst_11 = arith.constant 0.000000e+00 : f32
    %24 = arith.addf %cst_11, %23 : f32
    %c1 = arith.constant 1 : index
    %25 = memref.load %arg0[%c1] : memref<8xf32, #tpu.memory_space<smem>>
    %c1_12 = arith.constant 1 : index
    %26 = memref.load %arg1[%c1_12] : memref<8xf32, #tpu.memory_space<smem>>
    %27 = arith.subf %25, %26 : f32
    %28 = arith.mulf %27, %27 : f32
    %29 = arith.addf %24, %28 : f32
    %c2 = arith.constant 2 : index
    %30 = memref.load %arg0[%c2] : memref<8xf32, #tpu.memory_space<smem>>
    %c2_13 = arith.constant 2 : index
    %31 = memref.load %arg1[%c2_13] : memref<8xf32, #tpu.memory_space<smem>>
    %32 = arith.subf %30, %31 : f32
    %33 = arith.mulf %32, %32 : f32
    %34 = arith.addf %29, %33 : f32
    %c3 = arith.constant 3 : index
    %35 = memref.load %arg0[%c3] : memref<8xf32, #tpu.memory_space<smem>>
    %c3_14 = arith.constant 3 : index
    %36 = memref.load %arg1[%c3_14] : memref<8xf32, #tpu.memory_space<smem>>
    %37 = arith.subf %35, %36 : f32
    %38 = arith.mulf %37, %37 : f32
    %39 = arith.addf %34, %38 : f32
    %c4 = arith.constant 4 : index
    %40 = memref.load %arg0[%c4] : memref<8xf32, #tpu.memory_space<smem>>
    %c4_15 = arith.constant 4 : index
    %41 = memref.load %arg1[%c4_15] : memref<8xf32, #tpu.memory_space<smem>>
    %42 = arith.subf %40, %41 : f32
    %43 = arith.mulf %42, %42 : f32
    %44 = arith.addf %39, %43 : f32
    %c5 = arith.constant 5 : index
    %45 = memref.load %arg0[%c5] : memref<8xf32, #tpu.memory_space<smem>>
    %c5_16 = arith.constant 5 : index
    %46 = memref.load %arg1[%c5_16] : memref<8xf32, #tpu.memory_space<smem>>
    %47 = arith.subf %45, %46 : f32
    %48 = arith.mulf %47, %47 : f32
    %49 = arith.addf %44, %48 : f32
    %c6 = arith.constant 6 : index
    %50 = memref.load %arg0[%c6] : memref<8xf32, #tpu.memory_space<smem>>
    %c6_17 = arith.constant 6 : index
    %51 = memref.load %arg1[%c6_17] : memref<8xf32, #tpu.memory_space<smem>>
    %52 = arith.subf %50, %51 : f32
    %53 = arith.mulf %52, %52 : f32
    %54 = arith.addf %49, %53 : f32
    %c7 = arith.constant 7 : index
    %55 = memref.load %arg0[%c7] : memref<8xf32, #tpu.memory_space<smem>>
    %c7_18 = arith.constant 7 : index
    %56 = memref.load %arg1[%c7_18] : memref<8xf32, #tpu.memory_space<smem>>
    %57 = arith.subf %55, %56 : f32
    %58 = arith.mulf %57, %57 : f32
    %59 = arith.addf %54, %58 : f32
    %cst_19 = arith.constant 2.000000e+00 : f32
    %60 = arith.mulf %cst_19, %59 : f32
    %cst_20 = arith.constant 8.000000e+00 : f32
    %61 = arith.divf %60, %cst_20 : f32
    %62 = arith.addf %19, %61 : f32
    %63 = vector.extract_strided_slice %1 {offsets = [0, 0, 0], sizes = [8, 1, 8], strides = [1, 1, 1]} : vector<8x3x16xf32> to vector<8x1x8xf32>
    %64 = vector.extract_strided_slice %63 {offsets = [0, 0, 1], sizes = [8, 1, 7], strides = [1, 1, 1]} : vector<8x1x8xf32> to vector<8x1x7xf32>
    %65 = vector.extract_strided_slice %63 {offsets = [0, 0, 0], sizes = [8, 1, 7], strides = [1, 1, 1]} : vector<8x1x8xf32> to vector<8x1x7xf32>
    %66 = arith.subf %64, %65 : vector<8x1x7xf32>
    %cst_21 = arith.constant 1.300000e+00 : f32
    %67 = vector.broadcast %cst_21 : f32 to vector<8x1x7xf32>
    %68 = arith.addf %66, %67 : vector<8x1x7xf32>
    %69 = arith.negf %68 : vector<8x1x7xf32>
    %70 = math.exp %69 : vector<8x1x7xf32>
    %cst_22 = arith.constant 1.000000e+00 : f32
    %71 = vector.broadcast %cst_22 : f32 to vector<8x1x7xf32>
    %72 = arith.addf %71, %70 : vector<8x1x7xf32>
    %73 = arith.divf %71, %72 : vector<8x1x7xf32>
    %cst_23 = arith.constant 1.000000e+00 : f32
    %74 = vector.broadcast %cst_23 : f32 to vector<8x1x7xf32>
    %75 = arith.addf %74, %73 : vector<8x1x7xf32>
    %76 = vector.extract_strided_slice %2 {offsets = [0, 0, 1], sizes = [8, 1, 7], strides = [1, 1, 1]} : vector<8x3x16xf32> to vector<8x1x7xf32>
    %77 = math.absf %76 : vector<8x1x7xf32>
    %78 = arith.mulf %77, %75 : vector<8x1x7xf32>
    %79 = vector.shape_cast %78 : vector<8x1x7xf32> to vector<1x8x1x7xf32>
    %cst_24 = arith.constant dense<0.000000e+00> : vector<1xf32>
    %80 = vector.multi_reduction <add>, %79, %cst_24 [1, 2, 3] : vector<1x8x1x7xf32> to vector<1xf32>
    %81 = vector.shape_cast %80 : vector<1xf32> to vector<1x1x1x1xf32>
    %82 = vector.extract %81[0, 0, 0, 0] : f32 from vector<1x1x1x1xf32>
    %cst_25 = arith.constant 5.600000e+01 : f32
    %83 = arith.divf %82, %cst_25 : f32
    %84 = vector.extract_strided_slice %1 {offsets = [0, 1, 0], sizes = [8, 1, 6], strides = [1, 1, 1]} : vector<8x3x16xf32> to vector<8x1x6xf32>
    %85 = vector.extract_strided_slice %1 {offsets = [0, 2, 0], sizes = [8, 1, 6], strides = [1, 1, 1]} : vector<8x3x16xf32> to vector<8x1x6xf32>
    %86 = arith.mulf %84, %84 : vector<8x1x6xf32>
    %87 = arith.mulf %85, %85 : vector<8x1x6xf32>
    %88 = arith.addf %86, %87 : vector<8x1x6xf32>
    %89 = math.sqrt %88 : vector<8x1x6xf32>
    %90 = vector.extract_strided_slice %89 {offsets = [0, 0, 1], sizes = [8, 1, 5], strides = [1, 1, 1]} : vector<8x1x6xf32> to vector<8x1x5xf32>
    %91 = vector.extract_strided_slice %89 {offsets = [0, 0, 0], sizes = [8, 1, 5], strides = [1, 1, 1]} : vector<8x1x6xf32> to vector<8x1x5xf32>
    %92 = arith.subf %90, %91 : vector<8x1x5xf32>
    %93 = math.absf %92 : vector<8x1x5xf32>
    %94 = arith.negf %93 : vector<8x1x5xf32>
    %95 = math.exp %94 : vector<8x1x5xf32>
    %cst_26 = arith.constant 1.000000e+00 : f32
    %96 = vector.broadcast %cst_26 : f32 to vector<8x1x5xf32>
    %97 = arith.addf %96, %95 : vector<8x1x5xf32>
    %98 = arith.divf %96, %97 : vector<8x1x5xf32>
    %cst_27 = arith.constant 1.000000e+00 : f32
    %99 = vector.broadcast %cst_27 : f32 to vector<8x1x5xf32>
    %100 = arith.addf %99, %98 : vector<8x1x5xf32>
    %101 = vector.extract_strided_slice %0 {offsets = [0, 1, 1], sizes = [8, 1, 5], strides = [1, 1, 1]} : vector<8x3x16xf32> to vector<8x1x5xf32>
    %102 = vector.extract_strided_slice %0 {offsets = [0, 2, 1], sizes = [8, 1, 5], strides = [1, 1, 1]} : vector<8x3x16xf32> to vector<8x1x5xf32>
    %103 = arith.mulf %101, %101 : vector<8x1x5xf32>
    %104 = arith.mulf %102, %102 : vector<8x1x5xf32>
    %105 = arith.addf %103, %104 : vector<8x1x5xf32>
    %106 = math.sqrt %105 : vector<8x1x5xf32>
    %107 = vector.extract_strided_slice %89 {offsets = [0, 0, 1], sizes = [8, 1, 5], strides = [1, 1, 1]} : vector<8x1x6xf32> to vector<8x1x5xf32>
    %108 = arith.subf %106, %107 : vector<8x1x5xf32>
    %109 = math.absf %108 : vector<8x1x5xf32>
    %110 = arith.mulf %109, %100 : vector<8x1x5xf32>
    %111 = vector.shape_cast %110 : vector<8x1x5xf32> to vector<1x8x1x5xf32>
    %cst_28 = arith.constant dense<0.000000e+00> : vector<1xf32>
    %112 = vector.multi_reduction <add>, %111, %cst_28 [1, 2, 3] : vector<1x8x1x5xf32> to vector<1xf32>
    %113 = vector.shape_cast %112 : vector<1xf32> to vector<1x1x1x1xf32>
    %114 = vector.extract %113[0, 0, 0, 0] : f32 from vector<1x1x1x1xf32>
    %cst_29 = arith.constant 4.000000e+01 : f32
    %115 = arith.divf %114, %cst_29 : f32
    %116 = arith.addf %83, %115 : f32
    %cst_30 = arith.constant 1.000000e-01 : f32
    %117 = arith.mulf %cst_30, %116 : f32
    %118 = arith.addf %62, %117 : f32
    %c0_31 = arith.constant 0 : index
    %c0_32 = arith.constant 0 : index
    %119 = vector.load %arg4[%c0_31, %c0_32] : memref<8x32xf32, #tpu.memory_space<vmem>>, vector<8x32xf32>
    %cst_33 = arith.constant dense<0.000000e+00> : vector<32xf32>
    %120 = vector.multi_reduction <add>, %119, %cst_33 [0] : vector<8x32xf32> to vector<32xf32>
    %121 = vector.shape_cast %120 : vector<32xf32> to vector<1x32xf32>
    %cst_34 = arith.constant 8.000000e+00 : f32
    %122 = vector.broadcast %cst_34 : f32 to vector<1x32xf32>
    %123 = arith.divf %121, %122 : vector<1x32xf32>
    %124 = vector.broadcast %123 : vector<1x32xf32> to vector<8x32xf32>
    %125 = arith.subf %119, %124 : vector<8x32xf32>
    %cst_35 = arith.constant dense<0.000000e+00> : vector<32x32xf32>
    %126 = tpu.matmul %125, %125, %cst_35 {dimension_numbers = #tpu.dot_dimension_numbers<[0], [0], [1], [1], [0, 1, 1, 1], [], []>} : vector<8x32xf32>, vector<8x32xf32>, vector<32x32xf32> -> vector<32x32xf32>
    %cst_36 = arith.constant 8.000000e+00 : f32
    %127 = vector.broadcast %cst_36 : f32 to vector<32x32xf32>
    %128 = arith.divf %126, %127 : vector<32x32xf32>
    %cst_37 = arith.constant dense<0x7F800000> : vector<32xf32>
    %129 = vector.multi_reduction <minimumf>, %128, %cst_37 [0] : vector<32x32xf32> to vector<32xf32>
    %130 = vector.shape_cast %129 : vector<32xf32> to vector<1x32xf32>
    %cst_38 = arith.constant dense<0xFF800000> : vector<32xf32>
    %131 = vector.multi_reduction <maximumf>, %128, %cst_38 [0] : vector<32x32xf32> to vector<32xf32>
    %132 = vector.shape_cast %131 : vector<32xf32> to vector<1x32xf32>
    %133 = arith.subf %132, %130 : vector<1x32xf32>
    %134 = tpu.reciprocal %133 {approx = true} : vector<1x32xf32> -> vector<1x32xf32>
    %135 = vector.broadcast %130 : vector<1x32xf32> to vector<32x32xf32>
    %136 = arith.subf %128, %135 : vector<32x32xf32>
    %137 = vector.broadcast %134 : vector<1x32xf32> to vector<32x32xf32>
    %138 = arith.mulf %136, %137 : vector<32x32xf32>
    %139 = tpu.iota {dimensions = array<i32: 0>} : vector<32x32xi32>
    %140 = tpu.iota {dimensions = array<i32: 1>} : vector<32x32xi32>
    %141 = arith.cmpi eq, %139, %140 : vector<32x32xi32>
    %142 = arith.extui %141 : vector<32x32xi1> to vector<32x32xi32>
    %143 = arith.sitofp %142 : vector<32x32xi32> to vector<32x32xf32>
    %144 = arith.subf %138, %143 : vector<32x32xf32>
    %145 = arith.mulf %144, %144 : vector<32x32xf32>
    %146 = vector.shape_cast %145 : vector<32x32xf32> to vector<1x32x32xf32>
    %cst_39 = arith.constant dense<0.000000e+00> : vector<1xf32>
    %147 = vector.multi_reduction <add>, %146, %cst_39 [1, 2] : vector<1x32x32xf32> to vector<1xf32>
    %148 = vector.shape_cast %147 : vector<1xf32> to vector<1x1x1xf32>
    %149 = vector.extract %148[0, 0, 0] : f32 from vector<1x1x1xf32>
    %cst_40 = arith.constant 0.00999999977 : f32
    %150 = arith.mulf %cst_40, %149 : f32
    %151 = arith.addf %118, %150 : f32
    %152 = arith.mulf %125, %125 : vector<8x32xf32>
    %cst_41 = arith.constant dense<0.000000e+00> : vector<32xf32>
    %153 = vector.multi_reduction <add>, %152, %cst_41 [0] : vector<8x32xf32> to vector<32xf32>
    %154 = vector.shape_cast %153 : vector<32xf32> to vector<1x32xf32>
    %cst_42 = arith.constant 7.000000e+00 : f32
    %155 = vector.broadcast %cst_42 : f32 to vector<1x32xf32>
    %156 = arith.divf %154, %155 : vector<1x32xf32>
    %157 = vector.shape_cast %123 : vector<1x32xf32> to vector<1x1x32xf32>
    %cst_43 = arith.constant dense<0.000000e+00> : vector<1xf32>
    %158 = vector.multi_reduction <add>, %157, %cst_43 [1, 2] : vector<1x1x32xf32> to vector<1xf32>
    %159 = vector.shape_cast %158 : vector<1xf32> to vector<1x1x1xf32>
    %160 = vector.extract %159[0, 0, 0] : f32 from vector<1x1x1xf32>
    %cst_44 = arith.constant 3.200000e+01 : f32
    %161 = arith.divf %160, %cst_44 : f32
    %162 = vector.shape_cast %156 : vector<1x32xf32> to vector<1x1x32xf32>
    %cst_45 = arith.constant dense<0.000000e+00> : vector<1xf32>
    %163 = vector.multi_reduction <add>, %162, %cst_45 [1, 2] : vector<1x1x32xf32> to vector<1xf32>
    %164 = vector.shape_cast %163 : vector<1xf32> to vector<1x1x1xf32>
    %165 = vector.extract %164[0, 0, 0] : f32 from vector<1x1x1xf32>
    %cst_46 = arith.constant 3.200000e+01 : f32
    %166 = arith.divf %165, %cst_46 : f32
    %167 = vector.broadcast %166 : f32 to vector<1x32xf32>
    %168 = arith.subf %156, %167 : vector<1x32xf32>
    %169 = arith.mulf %168, %168 : vector<1x32xf32>
    %170 = vector.shape_cast %169 : vector<1x32xf32> to vector<1x1x32xf32>
    %cst_47 = arith.constant dense<0.000000e+00> : vector<1xf32>
    %171 = vector.multi_reduction <add>, %170, %cst_47 [1, 2] : vector<1x1x32xf32> to vector<1xf32>
    %172 = vector.shape_cast %171 : vector<1xf32> to vector<1x1x1xf32>
    %173 = vector.extract %172[0, 0, 0] : f32 from vector<1x1x1xf32>
    %cst_48 = arith.constant 3.100000e+01 : f32
    %174 = arith.divf %173, %cst_48 : f32
    %cst_49 = arith.constant 1.000000e+00 : f32
    %175 = arith.divf %cst_49, %174 : f32
    %176 = vector.broadcast %175 : f32 to vector<1x32xf32>
    %177 = arith.mulf %156, %176 : vector<1x32xf32>
    %178 = vector.broadcast %161 : f32 to vector<1x32xf32>
    %179 = arith.subf %123, %178 : vector<1x32xf32>
    %180 = arith.mulf %179, %179 : vector<1x32xf32>
    %181 = vector.broadcast %175 : f32 to vector<1x32xf32>
    %182 = arith.mulf %180, %181 : vector<1x32xf32>
    %183 = arith.addf %182, %177 : vector<1x32xf32>
    %cst_50 = arith.constant 1.000000e+00 : f32
    %184 = vector.broadcast %cst_50 : f32 to vector<1x32xf32>
    %185 = arith.subf %183, %184 : vector<1x32xf32>
    %186 = math.log %177 : vector<1x32xf32>
    %187 = arith.subf %185, %186 : vector<1x32xf32>
    %188 = vector.shape_cast %187 : vector<1x32xf32> to vector<1x1x32xf32>
    %cst_51 = arith.constant dense<0.000000e+00> : vector<1xf32>
    %189 = vector.multi_reduction <add>, %188, %cst_51 [1, 2] : vector<1x1x32xf32> to vector<1xf32>
    %190 = vector.shape_cast %189 : vector<1xf32> to vector<1x1x1xf32>
    %191 = vector.extract %190[0, 0, 0] : f32 from vector<1x1x1xf32>
    %cst_52 = arith.constant 5.000000e-01 : f32
    %192 = arith.mulf %cst_52, %191 : f32
    %cst_53 = arith.constant 5.000000e-03 : f32
    %193 = arith.mulf %cst_53, %192 : f32
    %194 = arith.addf %151, %193 : f32
    %c0_54 = arith.constant 0 : index
    %195 = memref.load %arg5[%c0_54] : memref<6xf32, #tpu.memory_space<smem>>
    memref.store %194, %arg5[%c0_54] : memref<6xf32, #tpu.memory_space<smem>>
    %c1_55 = arith.constant 1 : index
    %196 = memref.load %arg5[%c1_55] : memref<6xf32, #tpu.memory_space<smem>>
    memref.store %19, %arg5[%c1_55] : memref<6xf32, #tpu.memory_space<smem>>
    %c2_56 = arith.constant 2 : index
    %197 = memref.load %arg5[%c2_56] : memref<6xf32, #tpu.memory_space<smem>>
    memref.store %61, %arg5[%c2_56] : memref<6xf32, #tpu.memory_space<smem>>
    %c3_57 = arith.constant 3 : index
    %198 = memref.load %arg5[%c3_57] : memref<6xf32, #tpu.memory_space<smem>>
    memref.store %117, %arg5[%c3_57] : memref<6xf32, #tpu.memory_space<smem>>
    %c4_58 = arith.constant 4 : index
    %199 = memref.load %arg5[%c4_58] : memref<6xf32, #tpu.memory_space<smem>>
    memref.store %150, %arg5[%c4_58] : memref<6xf32, #tpu.memory_space<smem>>
    %c5_59 = arith.constant 5 : index
    %200 = memref.load %arg5[%c5_59] : memref<6xf32, #tpu.memory_space<smem>>
    memref.store %193, %arg5[%c5_59] : memref<6xf32, #tpu.memory_space<smem>>
    return
  }
}

</mosaic_0001>

<bundles_post_ra>
// kernel: guided_loss.1
= control target key start
LH: loop header
LB: loop body
LE: loop exit
PB: predicated region body
PF: predicated region fallthrough
CT: control target
= control target key end

     0   :  { %10 = vsyncpa [#allocation3], 0  ;;  %s2338_s0 = inlined_call_operand.vmem [shape: f32[8], index: 0, kind: input, shape index: {}]   ;;  %s2339_s1 = inlined_call_operand.vmem [shape: f32[8], index: 1, kind: input, shape index: {}]   ;;  %s2340_s2 = inlined_call_operand.vmem [shape: f32[8,3,16], index: 2, kind: input, shape index: {}]   ;;  %s2341_s3 = inlined_call_operand.vmem [shape: f32[8,3,16], index: 3, kind: input, shape index: {}]   ;;  %s2342_s4 = inlined_call_operand.vmem [shape: f32[8,32], index: 4, kind: input, shape index: {}]   ;;  %s2343_s5 = inlined_call_operand.vmem [shape: f32[6], index: 5, kind: output, shape index: {}]  }
   0x1   :  { %11 = vsyncpa [#allocation6], 0 }
   0x2   :  { %12 = vsyncpa [#allocation4], 0  ;;  %s18_s20 = sshll.u32 %s2338_s0, 4  ;;  %s27_s23 = sshll.u32 %s2339_s1, 4  ;;  %s19_s20 = int_to_ptr.vmem [resolvable:$true] %s18_s20  ;;  %s28_s23 = int_to_ptr.vmem [resolvable:$true] %s27_s23 }
   0x3   :  { %s1600_s24 = smov [#allocation2]   ;;  %s1601_s25 = smov [#allocation5]  }
   0x4   :  { %21 = dma.vmem_to_smem %s19_s20, 16, %s1600_s24, [#allocation3]  }
   0x5   :  { %30 = dma.vmem_to_smem %s28_s23, 16, %s1601_s25, [#allocation6]  }
   0x6   :  { %1594 = dma.done.wait [#allocation3], 16  }
   0x7   :  { %1595 = vsyncadd [#allocation3], 4294967280 }
   0x8   :  { %1596 = dma.done.wait [#allocation6], 16  }
   0x9   :  { %1597 = vsyncadd [#allocation6], 4294967280 }
   0xa   :  { %45 = sfence }
   0xb   :  { %v1038_v0 = vld [vmem:[%s2342_s4] sm:$0xff]  ;;  %vm1039_vm0 = vcmask 261120   ;;  %v1602_v2 = vmov 8.0   ;;  %s1603_s1 = smov 1   ;;  %v1670_v9 = vld [vmem:[%s2341_s3 + $0x8] sm:$0x7] }
   0xc   :  { %v1655_v1 = vld [vmem:[%s2341_s3] sm:$0x7]  ;;  %1442 = vrcp.f32 %v1602_v2  ;;  %v1040_v3 = vsel %vm1039_vm0, %v1038_v0, 0.0  ;;  %v1663_v6 = vld [vmem:[%s2341_s3 + $0x4] sm:$0x7]  ;;  %v459_v12 = vmul.f32 %v1670_v9, %v1670_v9  ;;  %s1604_s27 = smov 127  }
   0xd   :  { %v1041_v4 = vrot.slane %v1040_v3, 4  ;;  %175 = vrot.lane.b32.xlu1 %v1655_v1, %s1603_s1  ;;  %177 = vrot.lane.b32.xlu2 %v1663_v6, %s1603_s1  ;;  %v458_v15 = vmul.f32 %v1663_v6, %v1663_v6  ;;  %v1681_v16 = vld [vmem:[%s2341_s3 + $0xc] sm:$0x7]  ;;  %v1688_v24 = vld [vmem:[%s2341_s3 + $0x10] sm:$0x7]  ;;  %s117_s9 = sld [smem:[#allocation5]] }
   0xe   :  { %v460_v18 = vmul.f32 %v1681_v16, %v1681_v16  ;;  %v475_v21 = vrot.slane %v459_v12, 1  ;;  %v461_v25 = vmul.f32 %v1688_v24, %v1688_v24  ;;  %v1705_v32 = vld [vmem:[%s2341_s3 + $0x14] sm:$0x7]  ;;  %s1359_s10 = sld [smem:[#allocation2 + $0x1]] }
   0xf   :  { %v1042_v5 = vadd.f32 %v1041_v4, %v1040_v3  ;;  %v474_v19 = vrot.slane %v458_v15, 1  ;;  %v462_v34 = vmul.f32 %v1705_v32, %v1705_v32  ;;  %s1360_s11 = sld [smem:[#allocation5 + $0x1]] }
  0x10   :  { %v476_v27 = vrot.slane %v460_v18, 1  ;;  %v491_v29 = vadd.f32 %v475_v21, %v459_v12  ;;  %v477_v31 = vrot.slane %v461_v25, 1  ;;  %s1361_s12 = sld [smem:[#allocation2 + $0x2]] }
  0x11   :  { %v1043_v7 = vrot.slane %v1042_v5, 2  ;;  %v490_v23 = vadd.f32 %v474_v19, %v458_v15  ;;  %v478_v38 = vrot.slane %v462_v34, 1  ;;  %s1362_s13 = sld [smem:[#allocation5 + $0x2]] }
  0x12   :  { %v1443_v8 = vpop.eup %1442  ;;  %v1707_v33 = vadd.f32 %v476_v27, %v460_v18  ;;  %v1715_v37 = vadd.f32 %v477_v31, %v461_v25  ;;  %vm528_vm4 = vcmp.eq.f32.partialorder %v491_v29, inf  ;;  %v531_v61 = vand.u32 2147483648, %v491_v29  ;;  %v60_v31 = vld [vmem:[%s2341_s3 + $0x18] sm:$0x7]  ;;  %s1363_s14 = sld [smem:[#allocation2 + $0x3]] }
  0x13   :  { %v158_v10 = vmul.f32 8.0, %v1443_v8  ;;  %v1044_v11 = vadd.f32 %v1043_v7, %v1042_v5  ;;  %vm162_vm1 = vweird.f32 %v1443_v8  ;;  %1444 = vrsqrt.f32 %v490_v23  ;;  %s1364_s17 = sld [smem:[#allocation5 + $0x3]] }
  0x14   :  { %1446 = vrsqrt.f32 %v491_v29  ;;  %v1720_v42 = vadd.f32 %v478_v38, %v462_v34  ;;  %vm516_vm2 = vcmp.eq.f32.partialorder %v490_v23, inf  ;;  %v519_v49 = vand.u32 2147483648, %v490_v23  ;;  %v61_v38 = vld [vmem:[%s2341_s3 + $0x1c] sm:$0x7]  ;;  %s1365_s20 = sld [smem:[#allocation2 + $0x4]] }
  0x15   :  { %v159_v13 = vsub.f32 1.0, %v158_v10  ;;  %v1045_v14 = vrot.slane %v1044_v11, 1  ;;  %179 = vrot.lane.b32.xlu1 %v1670_v9, %s1603_s1  ;;  %1448 = vrsqrt.f32 %v1707_v33  ;;  %vm518_vm3 = vcmp.eq.f32.partialorder %v490_v23, 0.0  ;;  %s123_s16 = ssub.f32 %s1359_s10, %s1360_s11 }
  0x16   :  { %1450 = vrsqrt.f32 %v1715_v37  ;;  %vm530_vm5 = vcmp.eq.f32.partialorder %v491_v29, 0.0  ;;  %vm540_vm6 = vcmp.eq.f32.partialorder %v1707_v33, inf  ;;  %v543_v12 = vand.u32 2147483648, %v1707_v33  ;;  %s1366_s22 = sld [smem:[#allocation5 + $0x4]] }
  0x17   :  { %v160_v17 = vmul.f32 %v1443_v8, %v159_v13  ;;  %v1046_v20 = vadd.f32 %v1045_v14, %v1044_v11  ;;  %1452 = vrsqrt.f32 %v1720_v42  ;;  %vm542_vm7 = vcmp.eq.f32.partialorder %v1707_v33, 0.0  ;;  %s124_s19 = smul.f32 %s123_s16, %s123_s16  ;;  %s128_s21 = ssub.f32 %s1361_s12, %s1362_s13 }
  0x18   :  { %vm552_vm8 = vcmp.eq.f32.partialorder %v1715_v37, inf  ;;  %vm554_vm9 = vcmp.eq.f32.partialorder %v1715_v37, 0.0  ;;  %vm564_vm10 = vcmp.eq.f32.partialorder %v1720_v42, inf  ;;  %v567_v27 = vand.u32 2147483648, %v1720_v42  ;;  %s1367_s26 = sld [smem:[#allocation2 + $0x5]] }
  0x19   :  { %v161_v22 = vadd.f32 %v1443_v8, %v160_v17  ;;  %v1445_v35 = vpop.eup %1444  ;;  %vm566_vm11 = vcmp.eq.f32.partialorder %v1720_v42, 0.0  ;;  %v463_v34 = vmul.f32 %v60_v31, %v60_v31  ;;  %s129_s24 = smul.f32 %s128_s21, %s128_s21  ;;  %s133_s25 = ssub.f32 %s1363_s14, %s1364_s17 }
  0x1a   :  { %v510_v36 = vmul.f32 %v1445_v35, %v490_v23  ;;  %v1447_v40 = vpop.eup %1446  ;;  %s1369_s29 = sld [smem:[#allocation2 + $0x6]] }
  0x1b   :  { %v1692_v26 = vsel %vm162_vm1, %v1443_v8, %v161_v22  ;;  %v522_v43 = vmul.f32 %v1447_v40, %v491_v29  ;;  %v1449_v45 = vpop.eup %1448  ;;  %s134_s28 = smul.f32 %s133_s25, %s133_s25  ;;  %s1370_s30 = sld [smem:[#allocation5 + $0x6]] }
  0x1c   :  { %v1695_v28 = vmul.f32 %v1046_v20, %v1692_v26  ;;  %v511_v39 = vmul.f32 %v1445_v35, %v510_v36  ;;  %v534_v48 = vmul.f32 %v1449_v45, %v1707_v33  ;;  %v1451_v51 = vpop.eup %1450  ;;  %v555_v20 = vand.u32 2147483648, %v1715_v37  ;;  %s1372_s8 = sld [smem:[#allocation5 + $0x7]] }
  0x1d   :  { %181 = vrot.lane.b32.xlu1 %v1681_v16, %s1603_s1  ;;  %v523_v46 = vmul.f32 %v1447_v40, %v522_v43  ;;  %v546_v55 = vmul.f32 %v1451_v51, %v1715_v37  ;;  %v1453_v63 = vpop.eup %1452 }
  0x1e   :  { %v1700_v30 = vsub.f32 %v1038_v0, %v1695_v28  ;;  %v512_v41 = vmul.f32 0.5, %v511_v39  ;;  %v535_v53 = vmul.f32 %v1449_v45, %v534_v48  ;;  %v558_v4 = vmul.f32 %v1453_v63, %v1720_v42 }
  0x1f   :  { %v524_v50 = vmul.f32 0.5, %v523_v46  ;;  %v547_v60 = vmul.f32 %v1451_v51, %v546_v55  ;;  %v464_v39 = vmul.f32 %v61_v38, %v61_v38 }
  0x20   :  { %1056 = vxpose.xlu0.b32.start.end [1/1] (short) (narrow) %v1700_v30, 32  ;;  %1399 = vmatpush.msra.mxu2 %v1700_v30  ;;  %v513_v44 = vsub.f32 1.5, %v512_v41  ;;  %v536_v57 = vmul.f32 0.5, %v535_v53  ;;  %v559_v11 = vmul.f32 %v1453_v63, %v558_v4 }
  0x21   :  { %1400 = vmatpush.msra.mxu3 %v1700_v30  ;;  %1116 = vmatpush.msra.mxu0 %v1700_v30  ;;  %v525_v54 = vsub.f32 1.5, %v524_v50  ;;  %v548_v2 = vmul.f32 0.5, %v547_v60  ;;  %v480_v41 = vrot.slane %v464_v39, 1  ;;  %s148_s10 = ssub.f32 %s1369_s29, %s1370_s30 }
  0x22   :  { %1398 = vmatpush.msra.mxu1 %v1700_v30  ;;  %v514_v47 = vmul.f32 %v1445_v35, %v513_v44  ;;  %v537_v62 = vsub.f32 1.5, %v536_v57  ;;  %v560_v15 = vmul.f32 0.5, %v559_v11  ;;  %v479_v35 = vrot.slane %v463_v34, 1 }
  0x23   :  { %v526_v59 = vmul.f32 %v1447_v40, %v525_v54  ;;  %v549_v7 = vsub.f32 1.5, %v548_v2  ;;  %s149_s12 = smul.f32 %s148_s10, %s148_s10 }
  0x24   :  { %v515_v52 = vmul.f32 %v514_v47, %v490_v23  ;;  %v538_v3 = vmul.f32 %v1449_v45, %v537_v62  ;;  %v561_v19 = vsub.f32 1.5, %v560_v15  ;;  %v495_v36 = vadd.f32 %v479_v35, %v463_v34 }
  0x25   :  { %v527_v0 = vmul.f32 %v526_v59, %v491_v29  ;;  %v550_v14 = vmul.f32 %v1451_v51, %v549_v7  ;;  %v496_v45 = vadd.f32 %v480_v41, %v464_v39 }
  0x26   :  { %v517_v56 = vsel %vm516_vm2, %v490_v23, %v515_v52  ;;  %v539_v10 = vmul.f32 %v538_v3, %v1707_v33  ;;  %v562_v22 = vmul.f32 %v1453_v63, %v561_v19  ;;  %1454 = vrsqrt.f32 %v495_v36  ;;  %v1786_v3 = vld [vmem:[%s2340_s2 + $0x4] sm:$0x7] }
  0x27   :  { %v1725_v58 = vsel %vm518_vm3, %v519_v49, %v517_v56  ;;  %v529_v5 = vsel %vm528_vm4, %v491_v29, %v527_v0  ;;  %v551_v18 = vmul.f32 %v550_v14, %v1715_v37  ;;  %1456 = vrsqrt.f32 %v496_v45 }
  0x28   :  { %603 = vrot.lane.b32.xlu1 %v1725_v58, %s1603_s1  ;;  %v1730_v8 = vsel %vm530_vm5, %v531_v61, %v529_v5  ;;  %v541_v13 = vsel %vm540_vm6, %v1707_v33, %v539_v10  ;;  %v563_v25 = vmul.f32 %v562_v22, %v1720_v42  ;;  %vm576_vm12 = vcmp.eq.f32.partialorder %v495_v36, inf }
  0x29   :  { %605 = vrot.lane.b32.xlu2 %v1730_v8, %s1603_s1  ;;  %v1741_v17 = vsel %vm542_vm7, %v543_v12, %v541_v13  ;;  %v553_v21 = vsel %vm552_vm8, %v1715_v37, %v551_v18  ;;  %v457_v37 = vmul.f32 %v1655_v1, %v1655_v1  ;;  %vm578_vm13 = vcmp.eq.f32.partialorder %v495_v36, 0.0 }
  0x2a   :  { %v1752_v23 = vsel %vm554_vm9, %v555_v20, %v553_v21  ;;  %v565_v29 = vsel %vm564_vm10, %v1720_v42, %v563_v25  ;;  %v579_v60 = vand.u32 2147483648, %v495_v36  ;;  %v802_v7 = vmul.f32 %v1786_v3, %v1786_v3 }
  0x2b   :  { %v1765_v33 = vsel %vm566_vm11, %v567_v27, %v565_v29  ;;  %v473_v40 = vrot.slane %v457_v37, 1  ;;  %vm588_vm14 = vcmp.eq.f32.partialorder %v496_v45, inf  ;;  %v591_v27 = vand.u32 2147483648, %v496_v45 }
  0x2c   :  { %v1455_v42 = vpop.eup %1454  ;;  %v818_v20 = vrot.slane %v802_v7, 1  ;;  %vm590_vm15 = vcmp.eq.f32.partialorder %v496_v45, 0.0 }
  0x2d   :  { %v1775_v43 = vadd.f32 %v473_v40, %v457_v37  ;;  %v570_v44 = vmul.f32 %v1455_v42, %v495_v36  ;;  %v1457_v52 = vpop.eup %1456 }
  0x2e   :  { %v582_v59 = vmul.f32 %v1457_v52, %v496_v45  ;;  %v1796_v35 = vadd.f32 %v818_v20, %v802_v7 }
  0x2f   :  { %v571_v46 = vmul.f32 %v1455_v42, %v570_v44  ;;  %1458 = vrsqrt.f32 %v1775_v43  ;;  %vm504_vm1 = vcmp.eq.f32.partialorder %v1775_v43, inf  ;;  %vm506_vm2 = vcmp.eq.f32.partialorder %v1775_v43, 0.0 }
  0x30   :  { %183 = vrot.lane.b32.xlu1 %v1688_v24, %s1603_s1  ;;  %v583_v5 = vmul.f32 %v1457_v52, %v582_v59  ;;  %v507_v59 = vand.u32 2147483648, %v1775_v43 }
  0x31   :  { %607 = vrot.lane.b32.xlu2 %v1741_v17, %s1603_s1  ;;  %v572_v48 = vmul.f32 0.5, %v571_v46 }
  0x32   :  { %v584_v13 = vmul.f32 0.5, %v583_v5 }
  0x33   :  { %v573_v50 = vsub.f32 1.5, %v572_v48 }
  0x34   :  { %v585_v19 = vsub.f32 1.5, %v584_v13 }
  0x35   :  { %v574_v53 = vmul.f32 %v1455_v42, %v573_v50  ;;  %v1459_v55 = vpop.eup %1458 }
  0x36   :  { %v498_v62 = vmul.f32 %v1459_v55, %v1775_v43  ;;  %v586_v22 = vmul.f32 %v1457_v52, %v585_v19 }
  0x37   :  { %v575_v56 = vmul.f32 %v574_v53, %v495_v36 }
  0x38   :  { %185 = vrot.lane.b32.xlu1 %v1705_v32, %s1603_s1  ;;  %v499_v11 = vmul.f32 %v1459_v55, %v498_v62 }
  0x39   :  { %609 = vrot.lane.b32.xlu2 %v1752_v23, %s1603_s1  ;;  %v577_v63 = vsel %vm576_vm12, %v495_v36, %v575_v56 }
  0x3a   :  { %v1780_v0 = vsel %vm578_vm13, %v579_v60, %v577_v63  ;;  %v500_v21 = vmul.f32 0.5, %v499_v11  ;;  %v1839_v11 = vld [vmem:[%s2340_s2] sm:$0x7] }
  0x3c   :  { %v501_v36 = vsub.f32 1.5, %v500_v21 }
  0x3e   :  { %v502_v46 = vmul.f32 %v1459_v55, %v501_v36 }
  0x40   :  { %187 = vrot.lane.b32.xlu1 %v60_v31, %s1603_s1  ;;  %v587_v31 = vmul.f32 %v586_v22, %v496_v45  ;;  %v503_v50 = vmul.f32 %v502_v46, %v1775_v43 }
  0x41   :  { %611 = vrot.lane.b32.xlu2 %v1765_v33, %s1603_s1 }
  0x42   :  { %v589_v37 = vsel %vm588_vm14, %v496_v45, %v587_v31  ;;  %v48_v45 = vld [vmem:[%s2340_s2 + $0x8] sm:$0x7]  ;;  %v505_v62 = vsel %vm504_vm1, %v1775_v43, %v503_v50 }
  0x43   :  { %v1799_v39 = vsel %vm590_vm15, %v591_v27, %v589_v37  ;;  %v803_v48 = vmul.f32 %v48_v45, %v48_v45  ;;  %v1841_v13 = vsel %vm506_vm2, %v507_v59, %v505_v62  ;;  %v1856_v22 = vsub.f32 %v48_v45, %v1670_v9  ;;  %v1886_v62 = vld [vmem:[%s2340_s2 + $0x10] sm:$0x7] }
  0x45   :  { %v819_v53 = vrot.slane %v803_v48, 1 }
  0x48   :  { %189 = vrot.lane.b32.xlu1 %v61_v38, %s1603_s1 }
  0x49   :  { %613 = vrot.lane.b32.xlu2 %v1780_v0, %s1603_s1 }
  0x51   :  { %615 = vrot.lane.b32.xlu2 %v1799_v39, %s1603_s1 }
  0x67   :  { %v178_v57 = vpop.permute.xlu2 %177 }
  0x68   :  { %v200_v2 = vsub.f32 %v1663_v6, %v178_v57 }
  0x6a   :  { %v208_v10 = vadd.f32 1.3, %v200_v2 }
  0x6c   :  { %v1374_v14 = vmul.f32 -1.442695, %v208_v10 }
  0x7f   :  { %v176_v47 = vpop.permute.xlu1 %175 }
  0x80   :  { %v199_v49 = vsub.f32 %v1655_v1, %v176_v47 }
  0x82   :  { %v207_v51 = vadd.f32 1.3, %v199_v49 }
  0x84   :  { %v1373_v54 = vmul.f32 -1.442695, %v207_v51 }
  0x86   :  { %1460 = vpow2.f32 %v1373_v54  ;;  %v1819_v54 = vld [vmem:[%s2340_s2 + $0xc] sm:$0x7] }
  0x87   :  { %v180_v61 = vpop.permute.xlu1 %179  ;;  %1462 = vpow2.f32 %v1374_v14  ;;  %v804_v57 = vmul.f32 %v1819_v54, %v1819_v54 }
  0x88   :  { %v201_v4 = vsub.f32 %v1670_v9, %v180_v61 }
  0x8a   :  { %v209_v12 = vadd.f32 1.3, %v201_v4  ;;  %v1834_v4 = vadd.f32 %v819_v53, %v803_v48 }
  0x8c   :  { %v1461_v15 = vpop.eup %1460  ;;  %v1375_v18 = vmul.f32 -1.442695, %v209_v12  ;;  %v820_v12 = vrot.slane %v804_v57, 1 }
  0x8d   :  { %v1793_v25 = vadd.f32 1.0, %v1461_v15  ;;  %v1463_v40 = vpop.eup %1462 }
  0x8e   :  { %1464 = vpow2.f32 %v1375_v18  ;;  %v240_v44 = vadd.f32 1.0, %v1463_v40  ;;  %v1850_v18 = vsub.f32 %v1839_v11, %v1655_v1  ;;  %v1858_v27 = vadd.f32 %v820_v12, %v804_v57 }
  0x8f   :  { %v182_v29 = vpop.permute.xlu1 %181  ;;  %1466 = vrcp.f32 %v1793_v25  ;;  %v258_v40 = vand.u32 2147483648, %v1793_v25  ;;  %vm252_vm7 = vweird.f32 %v1793_v25 }
  0x90   :  { %v202_v34 = vsub.f32 %v1681_v16, %v182_v29  ;;  %1468 = vrsqrt.f32 %v1796_v35  ;;  %v273_v29 = vand.u32 2147483648, %v240_v44  ;;  %vm267_vm3 = vweird.f32 %v240_v44 }
  0x91   :  { %v271_v37 = vand.u32 2147483647, %v240_v44  ;;  %v259_v57 = vor.u32 1.1754944e-38, %v258_v40  ;;  %v375_v59 = vand.u32 2147483647, %v1850_v18 }
  0x92   :  { %v210_v38 = vadd.f32 1.3, %v202_v34 }
  0x93   :  { %vm272_vm6 = vcmp.eq.f32.partialorder %v271_v37, 8.507059e+37 }
  0x94   :  { %v1376_v41 = vmul.f32 -1.442695, %v210_v38  ;;  %v1465_v42 = vpop.eup %1464  ;;  %v274_v38 = vor.u32 1.1754944e-38, %v273_v29 }
  0x95   :  { %v1804_v47 = vadd.f32 1.0, %v1465_v42  ;;  %v1809_v49 = vpop.eup %1466  ;;  %v1868_v42 = vsub.f32 %v1786_v3, %v1663_v6  ;;  %v256_v6 = vand.u32 2147483647, %v1793_v25 }
  0x96   :  { %1470 = vpow2.f32 %v1376_v41  ;;  %v1813_v51 = vpop.eup %1468  ;;  %v248_v55 = vmul.f32 %v1809_v49, %v1793_v25  ;;  %vm253_vm8 = vweird.f32 %v1809_v49 }
  0x97   :  { %1472 = vrcp.f32 %v240_v44  ;;  %v854_v61 = vmul.f32 %v1813_v51, %v1796_v35  ;;  %vm254_vm9 = vmor %vm252_vm7, %vm253_vm8  ;;  %vm257_vm10 = vcmp.eq.f32.partialorder %v256_v6, 8.507059e+37  ;;  %vm282_vm11 = vweird.f32 %v1804_v47 }
  0x98   :  { %1474 = vrcp.f32 %v1804_v47  ;;  %v249_v5 = vsub.f32 1.0, %v248_v55  ;;  %vm1088_vm8 = vcmask 64512  }
  0x99   :  { %v855_v14 = vmul.f32 %v1813_v51, %v854_v61 }
  0x9a   :  { %v604_v10 = vpop.permute.xlu1 %603  ;;  %v250_v21 = vmul.f32 %v1809_v49, %v249_v5 }
  0x9b   :  { %v626_v43 = vsub.f32 %v1725_v58, %v604_v10  ;;  %v1861_v31 = vmul.f32 0.5, %v855_v14  ;;  %v286_v14 = vand.u32 2147483647, %v1804_v47 }
  0x9c   :  { %v1471_v52 = vpop.eup %1470  ;;  %v251_v45 = vadd.f32 %v1809_v49, %v250_v21 }
  0x9d   :  { %v1473_v56 = vpop.eup %1472  ;;  %v1826_v60 = vadd.f32 1.0, %v1471_v52  ;;  %v634_v19 = vand.u32 2147483647, %v626_v43  ;;  %v376_v52 = vand.u32 2147483647, %v1868_v42  ;;  %vm287_vm14 = vcmp.eq.f32.partialorder %v286_v14, 8.507059e+37 }
  0x9e   :  { %v263_v63 = vmul.f32 %v1473_v56, %v240_v44  ;;  %v1832_v2 = vpop.eup %1474  ;;  %vm268_vm4 = vweird.f32 %v1473_v56 }
  0x9f   :  { %1476 = vrcp.f32 %v1826_v60  ;;  %v278_v15 = vmul.f32 %v1832_v2, %v1804_v47  ;;  %vm269_vm5 = vmor %vm267_vm3, %vm268_vm4  ;;  %v1382_v9 = vmul.f32 -1.442695, %v634_v19  ;;  %vm283_vm12 = vweird.f32 %v1832_v2 }
  0xa0   :  { %v264_v7 = vsub.f32 1.0, %v263_v63  ;;  %1478 = vrsqrt.f32 %v1834_v4  ;;  %vm284_vm13 = vmor %vm282_vm11, %vm283_vm12  ;;  %v303_v6 = vand.u32 2147483648, %v1826_v60  ;;  %vm297_vm15 = vweird.f32 %v1826_v60 }
  0xa1   :  { %v279_v36 = vsub.f32 1.0, %v278_v15  ;;  %1480 = vpow2.f32 %v1382_v9  ;;  %v857_v15 = vsub.f32 1.5, %v1861_v31  ;;  %vm860_vm3 = vcmp.eq.f32.partialorder %v1796_v35, inf }
  0xa2   :  { %v265_v20 = vmul.f32 %v1473_v56, %v264_v7  ;;  %v184_v41 = vpop.permute.xlu1 %183  ;;  %v288_v7 = vand.u32 2147483648, %v1804_v47  ;;  %v377_v47 = vand.u32 2147483647, %v1856_v22 }
  0xa3   :  { %v203_v48 = vsub.f32 %v1688_v24, %v184_v41  ;;  %v280_v61 = vmul.f32 %v1832_v2, %v279_v36  ;;  %v1906_v41 = vsub.f32 %v1819_v54, %v1681_v16  ;;  %v304_v54 = vor.u32 1.1754944e-38, %v303_v6 }
  0xa4   :  { %v266_v34 = vadd.f32 %v1473_v56, %v265_v20  ;;  %v289_v29 = vor.u32 1.1754944e-38, %v288_v7  ;;  %v863_v7 = vand.u32 2147483648, %v1796_v35 }
  0xa5   :  { %v1863_v1 = vpop.eup %1476  ;;  %v211_v53 = vadd.f32 1.3, %v203_v48  ;;  %v281_v43 = vadd.f32 %v1832_v2, %v280_v61 }
  0xa6   :  { %601 = vrot.lane.b32.xlu0 %v1841_v13, %s1603_s1  ;;  %v270_v46 = vsel %vm269_vm5, %v1473_v56, %v266_v34  ;;  %v293_v44 = vmul.f32 %v1863_v1, %v1826_v60  ;;  %v1878_v3 = vpop.eup %1478  ;;  %v255_v56 = vsel %vm254_vm9, %v1809_v49, %v251_v45  ;;  %v805_v49 = vmul.f32 %v1886_v62, %v1886_v62  ;;  %s138_s1 = ssub.f32 %s1365_s20, %s1366_s22 }
  0xa7   :  { %v275_v50 = vsel %vm272_vm6, %v274_v38, %v270_v46  ;;  %v1377_v63 = vmul.f32 -1.442695, %v211_v53  ;;  %v260_v5 = vsel %vm257_vm10, %v259_v57, %v255_v56  ;;  %v866_v10 = vmul.f32 %v1878_v3, %v1834_v4  ;;  %v1481_v37 = vpop.eup %1480 }
  0xa8   :  { %v368_v55 = vadd.f32 1.0, %v275_v50  ;;  %v367_v12 = vadd.f32 1.0, %v260_v5  ;;  %v294_v19 = vsub.f32 1.0, %v293_v44  ;;  %v285_v36 = vsel %vm284_vm13, %v1832_v2, %v281_v43  ;;  %s139_s6 = smul.f32 %s138_s1, %s138_s1 }
  0xa9   :  { %1482 = vpow2.f32 %v1377_v63  ;;  %v290_v38 = vsel %vm287_vm14, %v289_v29, %v285_v36  ;;  %v821_v40 = vrot.slane %v805_v49, 1  ;;  %v858_v46 = vmul.f32 %v1813_v51, %v857_v15  ;;  %v51_v63 = vld [vmem:[%s2340_s2 + $0x14] sm:$0x7] }
  0xaa   :  { %v384_v25 = vmul.f32 %v376_v52, %v368_v55  ;;  %v186_v20 = vpop.permute.xlu1 %185  ;;  %v383_v21 = vmul.f32 %v375_v59, %v367_v12  ;;  %1484 = vrsqrt.f32 %v1858_v27  ;;  %v369_v9 = vadd.f32 1.0, %v290_v38 }
  0xab   :  { %v204_v34 = vsub.f32 %v1705_v32, %v186_v20  ;;  %v867_v2 = vmul.f32 %v1878_v3, %v866_v10  ;;  %v295_v45 = vmul.f32 %v1863_v1, %v294_v19  ;;  %v1911_v44 = vadd.f32 1.0, %v1481_v37  ;;  %v606_v10 = vpop.permute.xlu2 %605 }
  0xac   :  { %401 = vrot.lane.b32.xlu1 %v384_v25, %s1604_s27  ;;  %399 = vrot.lane.b32.xlu2 %v383_v21, %s1604_s27  ;;  %v385_v52 = vmul.f32 %v377_v47, %v369_v9  ;;  %vm298_vm1 = vweird.f32 %v1863_v1  ;;  %v1919_v16 = vadd.f32 %v821_v40, %v805_v49  ;;  %v301_v51 = vand.u32 2147483647, %v1826_v60 }
  0xad   :  { %v212_v31 = vadd.f32 1.3, %v204_v34  ;;  %v296_v55 = vadd.f32 %v1863_v1, %v295_v45  ;;  %vm299_vm2 = vmor %vm297_vm15, %vm298_vm1  ;;  %v859_v57 = vmul.f32 %v858_v46, %v1796_v35  ;;  %v868_v59 = vmul.f32 0.5, %v867_v2 }
  0xae   :  { %vm302_vm4 = vcmp.eq.f32.partialorder %v301_v51, 8.507059e+37  ;;  %v806_v60 = vmul.f32 %v51_v63, %v51_v63  ;;  %v378_v5 = vand.u32 2147483647, %v1906_v41  ;;  %vm862_vm5 = vcmp.eq.f32.partialorder %v1796_v35, 0.0 }
  0xaf   :  { %v1483_v48 = vpop.eup %1482  ;;  %v1378_v50 = vmul.f32 -1.442695, %v212_v31  ;;  %v300_v61 = vsel %vm299_vm2, %v1863_v1, %v296_v55  ;;  %v861_v12 = vsel %vm860_vm3, %v1796_v35, %v859_v57  ;;  %v869_v43 = vsub.f32 1.5, %v868_v59 }
  0xb0   :  { %v1914_v53 = vadd.f32 1.0, %v1483_v48  ;;  %v1922_v56 = vpop.eup %1484  ;;  %v305_v25 = vsel %vm302_vm4, %v304_v54, %v300_v61  ;;  %v627_v14 = vsub.f32 %v1730_v8, %v606_v10  ;;  %v822_v20 = vrot.slane %v806_v60, 1 }
  0xb1   :  { %1486 = vpow2.f32 %v1378_v50  ;;  %v878_v1 = vmul.f32 %v1922_v56, %v1858_v27  ;;  %v370_v49 = vadd.f32 1.0, %v305_v25  ;;  %v864_v37 = vsel %vm862_vm5, %v863_v7, %v861_v12 }
  0xb2   :  { %1488 = vrcp.f32 %v1914_v53  ;;  %v635_v34 = vand.u32 2147483647, %v627_v14  ;;  %v1949_v38 = vsub.f32 %v1886_v62, %v1688_v24  ;;  %v870_v31 = vmul.f32 %v1878_v3, %v869_v43 }
  0xb3   :  { %1490 = vrcp.f32 %v1911_v44  ;;  %v386_v29 = vmul.f32 %v378_v5, %v370_v49  ;;  %v879_v47 = vmul.f32 %v1922_v56, %v878_v1  ;;  %v318_v46 = vand.u32 2147483648, %v1914_v53  ;;  %v608_v55 = vpop.permute.xlu2 %607 }
  0xb4   :  { %403 = vrot.lane.b32.xlu2 %v385_v52, %s1604_s27  ;;  %1492 = vrsqrt.f32 %v1919_v16  ;;  %v1383_v9 = vmul.f32 -1.442695, %v635_v34  ;;  %vm312_vm6 = vweird.f32 %v1914_v53  ;;  %v316_v35 = vand.u32 2147483647, %v1914_v53  ;;  %v1973_v52 = vld [vmem:[%s2340_s2 + $0x18] sm:$0x7] }
  0xb5   :  { %v1960_v24 = vadd.f32 %v822_v20, %v806_v60  ;;  %v1966_v3 = vsub.f32 %v51_v63, %v1705_v32  ;;  %vm872_vm9 = vcmp.eq.f32.partialorder %v1834_v4, inf  ;;  %v875_v50 = vand.u32 2147483648, %v1834_v4 }
  0xb6   :  { %v938_v51 = vsub.f32 %v864_v37, %v1725_v58  ;;  %v1977_v54 = vmul.f32 0.5, %v879_v47  ;;  %v319_v57 = vor.u32 1.1754944e-38, %v318_v46  ;;  %v628_v59 = vsub.f32 %v1741_v17, %v608_v55 }
  0xb7   :  { %v1487_v15 = vpop.eup %1486  ;;  %v871_v61 = vmul.f32 %v870_v31, %v1834_v4  ;;  %vm317_vm11 = vcmp.eq.f32.partialorder %v316_v35, 8.507059e+37  ;;  %v379_v49 = vand.u32 2147483647, %v1949_v38  ;;  %vm874_vm14 = vcmp.eq.f32.partialorder %v1834_v4, 0.0 }
  0xb8   :  { %v1489_v19 = vpop.eup %1488  ;;  %v1941_v21 = vadd.f32 1.0, %v1487_v15  ;;  %v636_v5 = vand.u32 2147483647, %v628_v59  ;;  %v946_v37 = vand.u32 2147483647, %v938_v51  ;;  %vm693_vm1 = vweird.f32 %v1911_v44 }
  0xb9   :  { %v1943_v36 = vpop.eup %1490  ;;  %v308_v40 = vmul.f32 %v1489_v19, %v1914_v53  ;;  %vm313_vm7 = vweird.f32 %v1489_v19  ;;  %v807_v53 = vmul.f32 %v1973_v52, %v1973_v52  ;;  %v873_v32 = vsel %vm872_vm9, %v1834_v4, %v871_v61 }
  0xba   :  { %1494 = vrcp.f32 %v1941_v21  ;;  %v1958_v45 = vpop.eup %1492  ;;  %v689_v62 = vmul.f32 %v1943_v36, %v1911_v44  ;;  %vm1982_vm10 = vmor %vm312_vm6, %vm313_vm7  ;;  %v333_v10 = vand.u32 2147483648, %v1941_v21  ;;  %v1384_v14 = vmul.f32 -1.442695, %v636_v5 }
  0xbb   :  { %v309_v2 = vsub.f32 1.0, %v308_v40  ;;  %1496 = vpow2.f32 %v1383_v9  ;;  %v890_v63 = vmul.f32 %v1958_v45, %v1919_v16  ;;  %vm327_vm12 = vweird.f32 %v1941_v21 }
  0xbc   :  { %405 = vrot.lane.b32.xlu2 %v386_v29, %s1604_s27  ;;  %1498 = vrsqrt.f32 %v1960_v24  ;;  %v690_v25 = vsub.f32 1.0, %v689_v62  ;;  %v331_v15 = vand.u32 2147483647, %v1941_v21  ;;  %v823_v47 = vrot.slane %v807_v53, 1 }
  0xbd   :  { %v310_v6 = vmul.f32 %v1489_v19, %v309_v2  ;;  %1500 = vpow2.f32 %v1384_v14  ;;  %v334_v46 = vor.u32 1.1754944e-38, %v333_v10  ;;  %v610_v2 = vpop.permute.xlu2 %609  ;;  %vm694_vm2 = vweird.f32 %v1943_v36 }
  0xbe   :  { %vm332_vm3 = vcmp.eq.f32.partialorder %v331_v15, 8.507059e+37  ;;  %vm2019_vm4 = vmor %vm693_vm1, %vm694_vm2  ;;  %v380_v5 = vand.u32 2147483647, %v1966_v3  ;;  %vm884_vm6 = vcmp.eq.f32.partialorder %v1858_v27, inf  ;;  %vm886_vm7 = vcmp.eq.f32.partialorder %v1858_v27, 0.0 }
  0xbf   :  { %v311_v60 = vadd.f32 %v1489_v19, %v310_v6  ;;  %v691_v6 = vmul.f32 %v1943_v36, %v690_v25 }
  0xc0   :  { %v1495_v58 = vpop.eup %1494 }
  0xc1   :  { %v323_v7 = vmul.f32 %v1495_v58, %v1941_v21  ;;  %v315_v1 = vsel %vm1982_vm10, %v1489_v19, %v311_v60  ;;  %v1497_v12 = vpop.eup %1496  ;;  %vm328_vm13 = vweird.f32 %v1495_v58  ;;  %v881_v19 = vsub.f32 1.5, %v1977_v54 }
  0xc2   :  { %v320_v43 = vsel %vm317_vm11, %v319_v57, %v315_v1  ;;  %v2000_v29 = vadd.f32 1.0, %v1497_v12  ;;  %v2006_v35 = vpop.eup %1498  ;;  %vm2010_vm15 = vmor %vm327_vm12, %vm328_vm13  ;;  %v697_v21 = vand.u32 2147483647, %v1911_v44  ;;  %v699_v54 = vand.u32 2147483648, %v1911_v44 }
  0xc3   :  { %v324_v20 = vsub.f32 1.0, %v323_v7  ;;  %v371_v34 = vadd.f32 1.0, %v320_v43  ;;  %v891_v57 = vmul.f32 %v1958_v45, %v890_v63  ;;  %v692_v60 = vadd.f32 %v1943_v36, %v691_v6  ;;  %v1501_v1 = vpop.eup %1500 }
  0xc4   :  { %v1072_v48 = vpop.trf.xlu0  ;;  %1502 = vrcp.f32 %v2000_v29  ;;  %vm698_vm5 = vcmp.eq.f32.partialorder %v697_v21, 8.507059e+37  ;;  %v700_v7 = vor.u32 1.1754944e-38, %v699_v54  ;;  %v882_v12 = vmul.f32 %v1922_v56, %v881_v19 }
  0xc5   :  { %1389 = vmatmul.msk.f32.vlgmr.msra.gmra.mxu0 %vm1088_vm8, %v1072_v48  ;;  %v387_v31 = vmul.f32 %v379_v49, %v371_v34  ;;  %v325_v9 = vmul.f32 %v1495_v58, %v324_v20  ;;  %v629_v48 = vsub.f32 %v1752_v23, %v610_v2  ;;  %v2033_v49 = vadd.f32 %v823_v47, %v807_v53  ;;  %v612_v47 = vpop.permute.xlu2 %611 }
  0xc6   :  { %v696_v61 = vsel %vm2019_vm4, %v1943_v36, %v692_v60  ;;  %v2046_v43 = vadd.f32 1.0, %v1501_v1  ;;  %v892_v15 = vmul.f32 0.5, %v891_v57  ;;  %v902_v20 = vmul.f32 %v2006_v35, %v1960_v24 }
  0xc7   :  { %407 = vrot.lane.b32.xlu2 %v387_v31, %s1604_s27  ;;  %v326_v55 = vadd.f32 %v1495_v58, %v325_v9  ;;  %v637_v59 = vand.u32 2147483647, %v629_v48  ;;  %v701_v53 = vsel %vm698_vm5, %v700_v7, %v696_v61  ;;  %v630_v31 = vsub.f32 %v1765_v33, %v612_v47 }
  0xc8   :  { %v794_v36 = vadd.f32 1.0, %v701_v53  ;;  %v883_v2 = vmul.f32 %v882_v12, %v1858_v27  ;;  %v893_v62 = vsub.f32 1.5, %v892_v15  ;;  %v903_v48 = vmul.f32 %v2006_v35, %v902_v20 }
  0xc9   :  { %v330_v25 = vsel %vm2010_vm15, %v1495_v58, %v326_v55  ;;  %v1385_v10 = vmul.f32 -1.442695, %v637_v59  ;;  %v2044_v58 = vld [vmem:[%s2340_s2 + $0x1c] sm:$0x7]  ;;  %v638_v6 = vand.u32 2147483647, %v630_v31  ;;  %vm708_vm9 = vweird.f32 %v2000_v29 }
  0xca   :  { %v335_v44 = vsel %vm332_vm3, %v334_v46, %v330_v25  ;;  %v2038_v63 = vpop.eup %1502  ;;  %v954_v9 = vmul.f32 %v946_v37, %v794_v36  ;;  %v876_v46 = vsel %vm874_vm14, %v875_v50, %v873_v32  ;;  %v887_v50 = vand.u32 2147483648, %v1858_v27  ;;  %s2314_s2 = sld [smem:[#allocation2 + $0x7]] }
  0xcb   :  { %v372_v14 = vadd.f32 1.0, %v335_v44  ;;  %1504 = vpow2.f32 %v1385_v10  ;;  %v704_v56 = vmul.f32 %v2038_v63, %v2000_v29  ;;  %v1386_v37 = vmul.f32 -1.442695, %v638_v6 }
  0xcc   :  { %v1073_v40 = vpop.trf.xlu0  ;;  %1506 = vrcp.f32 %v2046_v43  ;;  %v970_v55 = vrot.slane %v954_v9, 1  ;;  %v939_v4 = vsub.f32 %v876_v46, %v1730_v8  ;;  %v885_v60 = vsel %vm884_vm6, %v1858_v27, %v883_v2 }
  0xcd   :  { %1390 = vmatmul.msk.f32.vlgmr.msra.gmra.mxu1 %vm1088_vm8, %v1073_v40  ;;  %v388_v19 = vmul.f32 %v380_v5, %v372_v14  ;;  %1508 = vrsqrt.f32 %v2033_v49  ;;  %v808_v40 = vmul.f32 %v2044_v58, %v2044_v58  ;;  %v705_v51 = vsub.f32 1.0, %v704_v56 }
  0xce   :  { %979 = vrot.lane.b32.xlu1 %v970_v55, %s1604_s27  ;;  %v894_v25 = vmul.f32 %v1958_v45, %v893_v62  ;;  %v904_v5 = vmul.f32 0.5, %v903_v48  ;;  %1510 = vpow2.f32 %v1386_v37  ;;  %vm709_vm10 = vweird.f32 %v2038_v63 }
  0xcf   :  { %409 = vrot.lane.b32.xlu2 %v388_v19, %s1604_s27  ;;  %v824_v54 = vrot.slane %v808_v40, 1  ;;  %v706_v8 = vmul.f32 %v2038_v63, %v705_v51  ;;  %vm2087_vm11 = vmor %vm708_vm9, %vm709_vm10  ;;  %v712_v10 = vand.u32 2147483647, %v2000_v29  ;;  %v714_v61 = vand.u32 2147483648, %v2000_v29 }
  0xd0   :  { %v947_v15 = vand.u32 2147483647, %v939_v4  ;;  %v888_v20 = vsel %vm886_vm7, %v887_v50, %v885_v60  ;;  %v905_v19 = vsub.f32 1.5, %v904_v5  ;;  %vm896_vm12 = vcmp.eq.f32.partialorder %v1919_v16, inf  ;;  %s153_s13 = ssub.f32 %s2314_s2, %s1372_s8 }
  0xd1   :  { %v1505_v21 = vpop.eup %1504  ;;  %v2083_v1 = vadd.f32 %v824_v54, %v808_v40  ;;  %v707_v14 = vadd.f32 %v2038_v63, %v706_v8  ;;  %v715_v53 = vor.u32 1.1754944e-38, %v714_v61  ;;  %vm898_vm13 = vcmp.eq.f32.partialorder %v1919_v16, 0.0 }
  0xd2   :  { %v2067_v57 = vpop.eup %1506  ;;  %v2072_v32 = vadd.f32 1.0, %v1505_v21  ;;  %v899_v46 = vand.u32 2147483648, %v1919_v16  ;;  %v940_v2 = vsub.f32 %v888_v20, %v1741_v17  ;;  %v906_v55 = vmul.f32 %v2006_v35, %v905_v19 }
  0xd3   :  { %v2074_v59 = vpop.eup %1508  ;;  %v719_v44 = vmul.f32 %v2067_v57, %v2046_v43  ;;  %v711_v36 = vsel %vm2087_vm11, %v2038_v63, %v707_v14  ;;  %v614_v63 = vpop.permute.xlu2 %613  ;;  %v729_v50 = vand.u32 2147483648, %v2046_v43  ;;  %vm723_vm14 = vweird.f32 %v2046_v43 }
  0xd4   :  { %v1074_v34 = vpop.trf.xlu0  ;;  %1512 = vrcp.f32 %v2072_v32  ;;  %v914_v12 = vmul.f32 %v2074_v59, %v2033_v49  ;;  %v1511_v56 = vpop.eup %1510  ;;  %v631_v62 = vsub.f32 %v1780_v0, %v614_v63  ;;  %vm724_vm15 = vweird.f32 %v2067_v57 }
  0xd5   :  { %1391 = vmatmul.msk.f32.vlgmr.msra.gmra.mxu2 %vm1088_vm8, %v1074_v34  ;;  %v895_v34 = vmul.f32 %v894_v25, %v1919_v16  ;;  %1514 = vrsqrt.f32 %v2083_v1  ;;  %v720_v29 = vsub.f32 1.0, %v719_v44  ;;  %v2107_v27 = vadd.f32 1.0, %v1511_v56  ;;  %vm725_vm1 = vmor %vm723_vm14, %vm724_vm15 }
  0xd6   :  { %v915_v31 = vmul.f32 %v2074_v59, %v914_v12  ;;  %v639_v37 = vand.u32 2147483647, %v631_v62  ;;  %v727_v35 = vand.u32 2147483647, %v2046_v43  ;;  %v948_v25 = vand.u32 2147483647, %v940_v2 }
  0xd7   :  { %1516 = vrcp.f32 %v2107_v27  ;;  %v897_v6 = vsel %vm896_vm12, %v1919_v16, %v895_v34  ;;  %v721_v21 = vmul.f32 %v2067_v57, %v720_v29  ;;  %v907_v61 = vmul.f32 %v906_v55, %v1960_v24 }
  0xd8   :  { %v916_v54 = vmul.f32 0.5, %v915_v31  ;;  %v1387_v5 = vmul.f32 -1.442695, %v639_v37  ;;  %v900_v8 = vsel %vm898_vm13, %v899_v46, %v897_v6  ;;  %vm728_vm2 = vcmp.eq.f32.partialorder %v727_v35, 8.507059e+37 }
  0xd9   :  { %v722_v60 = vadd.f32 %v2067_v57, %v721_v21  ;;  %vm908_vm3 = vcmp.eq.f32.partialorder %v1960_v24, inf  ;;  %v911_v16 = vand.u32 2147483648, %v1960_v24  ;;  %vm910_vm4 = vcmp.eq.f32.partialorder %v1960_v24, 0.0 }
  0xda   :  { %v2103_v40 = vpop.eup %1512  ;;  %1518 = vpow2.f32 %v1387_v5  ;;  %v917_v14 = vsub.f32 1.5, %v916_v54  ;;  %v744_v19 = vand.u32 2147483648, %v2072_v32  ;;  %vm738_vm5 = vweird.f32 %v2072_v32 }
  0xdb   :  { %v734_v51 = vmul.f32 %v2103_v40, %v2072_v32  ;;  %v2120_v17 = vpop.eup %1514  ;;  %v726_v45 = vsel %vm725_vm1, %v2067_v57, %v722_v60  ;;  %vm739_vm6 = vweird.f32 %v2103_v40  ;;  %v742_v63 = vand.u32 2147483647, %v2072_v32 }
  0xdc   :  { %v1075_v7 = vpop.trf.xlu0  ;;  %v926_v43 = vmul.f32 %v2120_v17, %v2083_v1  ;;  %v918_v29 = vmul.f32 %v2074_v59, %v917_v14  ;;  %vm740_vm7 = vmor %vm738_vm5, %vm739_vm6  ;;  %vm920_vm10 = vcmp.eq.f32.partialorder %v2033_v49, inf  ;;  %vm753_vm11 = vweird.f32 %v2107_v27 }
  0xdd   :  { %1392 = vmatmul.msk.f32.vlgmr.msra.gmra.mxu3 %vm1088_vm8, %v1075_v7  ;;  %vm713_vm8 = vcmp.eq.f32.partialorder %v712_v10, 8.507059e+37  ;;  %v730_v7 = vor.u32 1.1754944e-38, %v729_v50  ;;  %v735_v44 = vsub.f32 1.0, %v734_v51  ;;  %v2130_v10 = vpop.eup %1516  ;;  %vm743_vm9 = vcmp.eq.f32.partialorder %v742_v63, 8.507059e+37 }
  0xde   :  { %v716_v47 = vsel %vm713_vm8, %v715_v53, %v711_v36  ;;  %v749_v57 = vmul.f32 %v2130_v10, %v2107_v27  ;;  %v909_v36 = vsel %vm908_vm3, %v1960_v24, %v907_v61  ;;  %v927_v56 = vmul.f32 %v2120_v17, %v926_v43 }
  0xdf   :  { %v795_v9 = vadd.f32 1.0, %v716_v47  ;;  %v731_v12 = vsel %vm728_vm2, %v730_v7, %v726_v45  ;;  %v736_v34 = vmul.f32 %v2103_v40, %v735_v44  ;;  %v616_v47 = vpop.permute.xlu2 %615  ;;  %v745_v24 = vor.u32 1.1754944e-38, %v744_v19 }
  0xe0   :  { %v796_v53 = vadd.f32 1.0, %v731_v12  ;;  %v632_v46 = vsub.f32 %v1799_v39, %v616_v47  ;;  %v912_v62 = vsel %vm910_vm4, %v911_v16, %v909_v36  ;;  %v928_v59 = vmul.f32 0.5, %v927_v56 }
  0xe1   :  { %v955_v48 = vmul.f32 %v947_v15, %v795_v9  ;;  %v941_v15 = vsub.f32 %v900_v8, %v1752_v23  ;;  %v737_v23 = vadd.f32 %v2103_v40, %v736_v34  ;;  %v1519_v9 = vpop.eup %1518  ;;  %v919_v54 = vmul.f32 %v918_v29, %v2033_v49 }
  0xe2   :  { %v956_v20 = vmul.f32 %v948_v25, %v796_v53  ;;  %v671_v6 = vadd.f32 1.0, %v1519_v9  ;;  %v640_v55 = vand.u32 2147483647, %v632_v46  ;;  %v942_v32 = vsub.f32 %v912_v62, %v1765_v33  ;;  %v188_v46 = vpop.permute.xlu1 %187 }
  0xe3   :  { %v971_v4 = vrot.slane %v955_v48, 1  ;;  %v949_v2 = vand.u32 2147483647, %v941_v15  ;;  %v750_v48 = vsub.f32 1.0, %v749_v57  ;;  %v741_v51 = vsel %vm740_vm7, %v2103_v40, %v737_v23 }
  0xe4   :  { %v972_v31 = vrot.slane %v956_v20, 1  ;;  %1520 = vrcp.f32 %v671_v6  ;;  %v746_v21 = vsel %vm743_vm9, %v745_v24, %v741_v51  ;;  %v1388_v37 = vmul.f32 -1.442695, %v640_v55  ;;  %v2182_v51 = vld [vmem:[%s2341_s3 + $0x18] sm:$0x7] }
  0xe5   :  { %981 = vrot.lane.b32.xlu1 %v971_v4, %s1604_s27  ;;  %v797_v4 = vadd.f32 1.0, %v746_v21  ;;  %v923_v50 = vand.u32 2147483648, %v2033_v49  ;;  %v751_v60 = vmul.f32 %v2130_v10, %v750_v48  ;;  %v929_v35 = vsub.f32 1.5, %v928_v59 }
  0xe6   :  { %1522 = vpow2.f32 %v1388_v37  ;;  %v759_v40 = vand.u32 2147483648, %v2107_v27  ;;  %vm754_vm8 = vweird.f32 %v2130_v10  ;;  %v757_v7 = vand.u32 2147483647, %v2107_v27 }
  0xe7   :  { %v957_v25 = vmul.f32 %v949_v2, %v797_v4  ;;  %v752_v5 = vadd.f32 %v2130_v10, %v751_v60  ;;  %v921_v33 = vsel %vm920_vm10, %v2033_v49, %v919_v54  ;;  %vm922_vm12 = vcmp.eq.f32.partialorder %v2033_v49, 0.0  ;;  %vm755_vm13 = vmor %vm753_vm11, %vm754_vm8 }
  0xe8   :  { %v760_v44 = vor.u32 1.1754944e-38, %v759_v40  ;;  %v950_v61 = vand.u32 2147483647, %v942_v32  ;;  %vm758_vm14 = vcmp.eq.f32.partialorder %v757_v7, 8.507059e+37  ;;  %v924_v53 = vsel %vm922_vm12, %v923_v50, %v921_v33 }
  0xe9   :  { %v973_v8 = vrot.slane %v957_v25, 1  ;;  %v756_v43 = vsel %vm755_vm13, %v2130_v10, %v752_v5  ;;  %v930_v16 = vmul.f32 %v2120_v17, %v929_v35  ;;  %v801_v34 = vmul.f32 %v1839_v11, %v1839_v11 }
  0xea   :  { %v1521_v45 = vpop.eup %1520  ;;  %v761_v14 = vsel %vm758_vm14, %v760_v44, %v756_v43  ;;  %v943_v36 = vsub.f32 %v924_v53, %v1780_v0  ;;  %v774_v10 = vand.u32 2147483648, %v671_v6  ;;  %vm768_vm15 = vweird.f32 %v671_v6  ;;  %v190_v40 = vpop.permute.xlu1 %189 }
  0xeb   :  { %v764_v12 = vmul.f32 %v1521_v45, %v671_v6  ;;  %v798_v27 = vadd.f32 1.0, %v761_v14  ;;  %v931_v19 = vmul.f32 %v930_v16, %v2083_v1  ;;  %vm769_vm1 = vweird.f32 %v1521_v45 }
  0xec   :  { %v1523_v15 = vpop.eup %1522  ;;  %v772_v17 = vand.u32 2147483647, %v671_v6  ;;  %vm932_vm2 = vcmp.eq.f32.partialorder %v2083_v1, inf  ;;  %vm770_vm3 = vmor %vm768_vm15, %vm769_vm1  ;;  %v817_v23 = vrot.slane %v801_v34, 1  ;;  %v951_v9 = vand.u32 2147483647, %v943_v36 }
  0xed   :  { %983 = vrot.lane.b32.xlu1 %v972_v31, %s1604_s27  ;;  %v765_v57 = vsub.f32 1.0, %v764_v12  ;;  %v672_v20 = vadd.f32 1.0, %v1523_v15  ;;  %v958_v49 = vmul.f32 %v950_v61, %v798_v27  ;;  %v775_v31 = vor.u32 1.1754944e-38, %v774_v10 }
  0xee   :  { %vm773_vm4 = vcmp.eq.f32.partialorder %v772_v17, 8.507059e+37  ;;  %v935_v0 = vand.u32 2147483648, %v2083_v1  ;;  %v933_v24 = vsel %vm932_vm2, %v2083_v1, %v931_v19  ;;  %vm934_vm5 = vcmp.eq.f32.partialorder %v2083_v1, 0.0 }
  0xef   :  { %v766_v56 = vmul.f32 %v1521_v45, %v765_v57  ;;  %1524 = vrcp.f32 %v672_v20  ;;  %v974_v29 = vrot.slane %v958_v49, 1  ;;  %v2177_v48 = vadd.f32 %v817_v23, %v801_v34 }
  0xf0   :  { %v936_v55 = vsel %vm934_vm5, %v935_v0, %v933_v24  ;;  %v205_v21 = vsub.f32 %v2182_v51, %v188_v46  ;;  %vm783_vm6 = vweird.f32 %v672_v20  ;;  %v789_v54 = vand.u32 2147483648, %v672_v20 }
  0xf1   :  { %v767_v47 = vadd.f32 %v1521_v45, %v766_v56  ;;  %v787_v1 = vand.u32 2147483647, %v672_v20  ;;  %1526 = vrsqrt.f32 %v2177_v48  ;;  %v944_v32 = vsub.f32 %v936_v55, %v1799_v39 }
  0xf2   :  { %v213_v60 = vadd.f32 1.3, %v205_v21  ;;  %v790_v35 = vor.u32 1.1754944e-38, %v789_v54  ;;  %vm848_vm11 = vcmp.eq.f32.partialorder %v2177_v48, inf  ;;  %v851_v0 = vand.u32 2147483648, %v2177_v48 }
  0xf3   :  { %v771_v11 = vsel %vm770_vm3, %v1521_v45, %v767_v47  ;;  %vm788_vm10 = vcmp.eq.f32.partialorder %v787_v1, 8.507059e+37  ;;  %v952_v5 = vand.u32 2147483647, %v944_v32  ;;  %v2191_v45 = vld [vmem:[%s2341_s3 + $0x1c] sm:$0x7]  ;;  %vm850_vm8 = vcmp.eq.f32.partialorder %v2177_v48, 0.0 }
  0xf4   :  { %v776_v63 = vsel %vm773_vm4, %v775_v31, %v771_v11  ;;  %v1379_v33 = vmul.f32 -1.442695, %v213_v60  ;;  %v206_v39 = vsub.f32 %v2191_v45, %v190_v40  ;;  %s116_s3 = sld [smem:[#allocation2]] }
  0xf5   :  { %985 = vrot.lane.b32.xlu1 %v973_v8, %s1604_s27  ;;  %v799_v2 = vadd.f32 1.0, %v776_v63  ;;  %v1525_v62 = vpop.eup %1524 }
  0xf6   :  { %v779_v6 = vmul.f32 %v1525_v62, %v672_v20  ;;  %vm784_vm7 = vweird.f32 %v1525_v62  ;;  %1528 = vpow2.f32 %v1379_v33  ;;  %v214_v14 = vadd.f32 1.3, %v206_v39 }
  0xf7   :  { %v959_v59 = vmul.f32 %v951_v9, %v799_v2  ;;  %vm785_vm9 = vmor %vm783_vm6, %vm784_vm7  ;;  %v1527_v44 = vpop.eup %1526 }
  0xf8   :  { %v780_v37 = vsub.f32 1.0, %v779_v6  ;;  %v842_v12 = vmul.f32 %v1527_v44, %v2177_v48  ;;  %v1380_v57 = vmul.f32 -1.442695, %v214_v14 }
  0xf9   :  { %v975_v4 = vrot.slane %v959_v59, 1 }
  0xfa   :  { %v781_v50 = vmul.f32 %v1525_v62, %v780_v37  ;;  %v843_v16 = vmul.f32 %v1527_v44, %v842_v12  ;;  %1530 = vpow2.f32 %v1380_v57  ;;  %s118_s15 = ssub.f32 %s116_s3, %s117_s9 }
  0xfc   :  { %v782_v25 = vadd.f32 %v1525_v62, %v781_v50  ;;  %v1529_v20 = vpop.eup %1528  ;;  %v844_v34 = vmul.f32 0.5, %v843_v16  ;;  %s119_s18 = smul.f32 %s118_s15, %s118_s15 }
  0xfd   :  { %987 = vrot.lane.b32.xlu1 %v974_v29, %s1604_s27  ;;  %v245_v36 = vadd.f32 1.0, %v1529_v20  ;;  %s154_s15 = smul.f32 %s153_s13, %s153_s13 }
  0xfe   :  { %v786_v7 = vsel %vm785_vm9, %v1525_v62, %v782_v25  ;;  %v845_v10 = vsub.f32 1.5, %v844_v34  ;;  %s125_s23 = sadd.f32 %s124_s19, %s119_s18 }
  0xff   :  { %v791_v8 = vsel %vm788_vm10, %v790_v35, %v786_v7  ;;  %vm342_vm14 = vweird.f32 %v245_v36  ;;  %v348_v35 = vand.u32 2147483648, %v245_v36 }
 0x100   :  { %v800_v61 = vadd.f32 1.0, %v791_v8  ;;  %v1531_v19 = vpop.eup %1530  ;;  %v846_v29 = vmul.f32 %v1527_v44, %v845_v10  ;;  %v71_v10 = vmul.f32 %v1868_v42, %v1868_v42  ;;  %s130_s0 = sadd.f32 %s129_s24, %s125_s23 }
 0x101   :  { %v246_v31 = vadd.f32 1.0, %v1531_v19  ;;  %v349_v33 = vor.u32 1.1754944e-38, %v348_v35 }
 0x102   :  { %v960_v43 = vmul.f32 %v952_v5, %v800_v61  ;;  %v847_v9 = vmul.f32 %v846_v29, %v2177_v48  ;;  %v346_v5 = vand.u32 2147483647, %v245_v36  ;;  %v68_v61 = vsub.f32 %v1973_v52, %v2182_v51  ;;  %s135_s4 = sadd.f32 %s134_s28, %s130_s0 }
 0x103   :  { %vm357_vm5 = vweird.f32 %v246_v31  ;;  %v363_v14 = vand.u32 2147483648, %v246_v31  ;;  %v69_v52 = vsub.f32 %v2044_v58, %v2191_v45  ;;  %v72_v58 = vmul.f32 %v1856_v22, %v1856_v22 }
 0x104   :  { %v976_v53 = vrot.slane %v960_v43, 1  ;;  %v849_v46 = vsel %vm848_vm11, %v2177_v48, %v847_v9  ;;  %vm347_vm4 = vcmp.eq.f32.partialorder %v346_v5, 8.507059e+37  ;;  %v381_v57 = vand.u32 2147483647, %v68_v61  ;;  %s140_s3 = sadd.f32 %s139_s6, %s135_s4 }
 0x105   :  { %989 = vrot.lane.b32.xlu1 %v975_v4, %s1604_s27  ;;  %v852_v2 = vsel %vm850_vm8, %v851_v0, %v849_v46  ;;  %v364_v20 = vor.u32 1.1754944e-38, %v363_v14  ;;  %v382_v29 = vand.u32 2147483647, %v69_v52  ;;  %vm90_vm11 = vcmask 124928  }
 0x106   :  { %v937_v55 = vsub.f32 %v852_v2, %v1841_v13  ;;  %v73_v9 = vmul.f32 %v1906_v41, %v1906_v41  ;;  %v74_v0 = vmul.f32 %v1949_v38, %v1949_v38  ;;  %v75_v46 = vmul.f32 %v1966_v3, %v1966_v3 }
 0x107   :  { %v76_v2 = vmul.f32 %v68_v61, %v68_v61 }
 0x108   :  { %v945_v50 = vand.u32 2147483647, %v937_v55 }
 0x10d   :  { %991 = vrot.lane.b32.xlu1 %v976_v53, %s1604_s27  ;;  %v78_v53 = vlaneseq }
 0x118   :  { %v602_v27 = vpop.permute.xlu0 %601 }
 0x119   :  { %v625_v15 = vsub.f32 %v1841_v13, %v602_v27  ;;  %v361_v27 = vand.u32 2147483647, %v246_v31 }
 0x11b   :  { %v633_v49 = vand.u32 2147483647, %v625_v15  ;;  %vm362_vm9 = vcmp.eq.f32.partialorder %v361_v27, 8.507059e+37 }
 0x11d   :  { %v1381_v56 = vmul.f32 -1.442695, %v633_v49  ;;  %v2207_v49 = vshrl.u32 %v78_v53, 7 }
 0x11f   :  { %1532 = vpow2.f32 %v1381_v56  ;;  %vm80_vm10 = vcmp.eq.s32.totalorder %v2207_v49, 0  ;;  %v70_v56 = vmul.f32 %v1850_v18, %v1850_v18 }
 0x120   :  { %1534 = vrcp.f32 %v245_v36 }
 0x125   :  { %v1533_v47 = vpop.eup %1532 }
 0x126   :  { %v665_v17 = vadd.f32 1.0, %v1533_v47  ;;  %v1535_v23 = vpop.eup %1534  ;;  %v1605_v47 = vmov 0.5  }
 0x127   :  { %v338_v11 = vmul.f32 %v1535_v23, %v245_v36  ;;  %vm343_vm15 = vweird.f32 %v1535_v23 }
 0x128   :  { %1536 = vrcp.f32 %v665_v17  ;;  %v684_v21 = vand.u32 2147483648, %v665_v17  ;;  %v682_v1 = vand.u32 2147483647, %v665_v17  ;;  %vm678_vm13 = vweird.f32 %v665_v17  ;;  %vm344_vm3 = vmor %vm342_vm14, %vm343_vm15 }
 0x129   :  { %1538 = vrcp.f32 %v246_v31  ;;  %v339_v24 = vsub.f32 1.0, %v338_v11  ;;  %vm1229_vm15 = vcmask 253952  }
 0x12a   :  { %v685_v48 = vor.u32 1.1754944e-38, %v684_v21  ;;  %vm683_vm2 = vcmp.eq.f32.partialorder %v682_v1, 8.507059e+37 }
 0x12b   :  { %v340_v54 = vmul.f32 %v1535_v23, %v339_v24 }
 0x12d   :  { %v341_v60 = vadd.f32 %v1535_v23, %v340_v54 }
 0x12e   :  { %v1537_v63 = vpop.eup %1536 }
 0x12f   :  { %v674_v62 = vmul.f32 %v1537_v63, %v665_v17  ;;  %v1539_v6 = vpop.eup %1538  ;;  %vm679_vm12 = vweird.f32 %v1537_v63  ;;  %v345_v44 = vsel %vm344_vm3, %v1535_v23, %v341_v60  ;;  %v81_v17 = vsel %vm80_vm10, 1.0, %v1605_v47 }
 0x130   :  { %v353_v37 = vmul.f32 %v1539_v6, %v246_v31  ;;  %vm680_vm1 = vmor %vm678_vm13, %vm679_vm12  ;;  %vm358_vm6 = vweird.f32 %v1539_v6  ;;  %v350_v12 = vsel %vm347_vm4, %v349_v33, %v345_v44  ;;  %v82_v31 = vmul.f32 %v81_v17, %v70_v56 }
 0x131   :  { %v675_v59 = vsub.f32 1.0, %v674_v62  ;;  %vm359_vm7 = vmor %vm357_vm5, %vm358_vm6  ;;  %v373_v15 = vadd.f32 1.0, %v350_v12  ;;  %v83_v45 = vmul.f32 %v81_v17, %v71_v10  ;;  %v84_v11 = vmul.f32 %v81_v17, %v72_v58 }
 0x132   :  { %v354_v25 = vsub.f32 1.0, %v353_v37  ;;  %v91_v18 = vsel %vm90_vm11, %v82_v31, 0.0  ;;  %v85_v22 = vmul.f32 %v81_v17, %v73_v9  ;;  %v77_v62 = vmul.f32 %v69_v52, %v69_v52 }
 0x133   :  { %v676_v4 = vmul.f32 %v1537_v63, %v675_v59  ;;  %v389_v51 = vmul.f32 %v381_v57, %v373_v15  ;;  %v92_v42 = vsel %vm90_vm11, %v83_v45, 0.0  ;;  %v94_v24 = vsel %vm90_vm11, %v84_v11, 0.0 }
 0x134   :  { %v355_v39 = vmul.f32 %v1539_v6, %v354_v25  ;;  %v86_v41 = vmul.f32 %v81_v17, %v74_v0  ;;  %v96_v21 = vsel %vm90_vm11, %v85_v22, 0.0  ;;  %v88_v37 = vmul.f32 %v81_v17, %v76_v2  ;;  %v2239_v25 = vpop.permute.xlu1 %401 }
 0x135   :  { %v677_v32 = vadd.f32 %v1537_v63, %v676_v4  ;;  %v1172_v2 = vadd.s32 24, %v2207_v49 }
 0x136   :  { %v356_v16 = vadd.f32 %v1539_v6, %v355_v39  ;;  %v98_v4 = vsel %vm90_vm11, %v86_v41, 0.0  ;;  %v102_v35 = vsel %vm90_vm11, %v88_v37, 0.0  ;;  %v1606_v37 = vmov 0.0  }
 0x137   :  { %v681_v40 = vsel %vm680_vm1, %v1537_v63, %v677_v32  ;;  %v93_v63 = vadd.f32 %v92_v42, %v91_v18  ;;  %v89_v32 = vmul.f32 %v81_v17, %v77_v62  ;;  %v1174_v62 = vand.u32 127, %v78_v53 }
 0x138   :  { %v686_v13 = vsel %vm683_vm2, %v685_v48, %v681_v40  ;;  %v360_v34 = vsel %vm359_vm7, %v1539_v6, %v356_v16  ;;  %v87_v6 = vmul.f32 %v81_v17, %v75_v46  ;;  %vm423_vm1 = vcmask 49152  }
 0x139   :  { %v793_v7 = vadd.f32 1.0, %v686_v13  ;;  %v365_v36 = vsel %vm362_vm9, %v364_v20, %v360_v34  ;;  %v95_v55 = vadd.f32 %v94_v24, %v93_v63  ;;  %v1170_v63 = vadd.s32 8, %v2207_v49 }
 0x13a   :  { %v374_v19 = vadd.f32 1.0, %v365_v36  ;;  %v1171_v24 = vadd.s32 16, %v2207_v49  ;;  %vm1175_vm8 = vcmp.eq.s32.totalorder %v2207_v49, %v1174_v62  ;;  %vm1178_vm14 = vcmp.eq.s32.totalorder %v1172_v2, %v1174_v62 }
 0x13b   :  { %v953_v8 = vmul.f32 %v945_v50, %v793_v7  ;;  %v97_v38 = vadd.f32 %v96_v21, %v95_v55  ;;  %v100_v50 = vsel %vm90_vm11, %v87_v6, 0.0  ;;  %v104_v7 = vsel %vm90_vm11, %v89_v32, 0.0 }
 0x13c   :  { %v390_v23 = vmul.f32 %v382_v29, %v374_v19  ;;  %v2262_v29 = vpop.permute.xlu2 %399  ;;  %vm1176_vm12 = vcmp.eq.s32.totalorder %v1170_v63, %v1174_v62  ;;  %vm1177_vm13 = vcmp.eq.s32.totalorder %v1171_v24, %v1174_v62  ;;  %vm1001_vm2 = vcmask 32768  }
 0x13d   :  { %v969_v43 = vrot.slane %v953_v8, 1  ;;  %v99_v60 = vadd.f32 %v98_v4, %v97_v38  ;;  %v1393_v4 = vsel %vm1175_vm8, 1.0, %v1606_v37  ;;  %v1394_v53 = vsel %vm1176_vm12, 1.0, %v1606_v37 }
 0x13e   :  { %v1395_v38 = vsel %vm1177_vm13, 1.0, %v1606_v37 }
 0x13f   :  { %977 = vrot.lane.b32.xlu2 %v969_v43, %s1604_s27  ;;  %v101_v5 = vadd.f32 %v100_v50, %v99_v60 }
 0x141   :  { %v103_v39 = vadd.f32 %v102_v35, %v101_v5 }
 0x142   :  { %v1118_v59 = vpop.f32.mrf.mxu0 }
 0x143   :  { %v2232_v1 = vmul.f32 %v1118_v59, %v1692_v26  ;;  %v105_v16 = vadd.f32 %v104_v7, %v103_v39 }
 0x144   :  { %v2266_v46 = vpop.permute.xlu2 %403 }
 0x145   :  { %v1134_v13 = vsel %vm1039_vm0, %v2232_v1, inf  ;;  %v1147_v33 = vsel %vm1039_vm0, %v2232_v1, -inf }
 0x147   :  { %411 = vrot.lane.b32.xlu2 %v389_v51, %s1604_s27  ;;  %v2260_v51 = vpop.permute.xlu1 %979 }
 0x14a   :  { %v1121_v54 = vpop.f32.mrf.mxu1 }
 0x14b   :  { %v2236_v48 = vmul.f32 %v1121_v54, %v1692_v26 }
 0x14c   :  { %v406_v32 = vpop.permute.xlu2 %405 }
 0x14d   :  { %v1135_v8 = vsel %vm1039_vm0, %v2236_v48, inf  ;;  %v1148_v44 = vsel %vm1039_vm0, %v2236_v48, -inf }
 0x14e   :  { %v1138_v27 = vmin.f32 %v1134_v13, %v1135_v8  ;;  %v1151_v15 = vmax.f32 %v1147_v33, %v1148_v44 }
 0x14f   :  { %413 = vrot.lane.b32.xlu2 %v390_v23, %s1604_s27  ;;  %s1368_s27 = sld [smem:[#allocation5 + $0x5]] }
 0x155   :  { %s143_s7 = ssub.f32 %s1367_s26, %s1368_s27 }
 0x157   :  { %v2264_v9 = vpop.permute.xlu1 %981  ;;  %s144_s9 = smul.f32 %s143_s7, %s143_s7 }
 0x158   :  { %v1124_v3 = vpop.f32.mrf.mxu2 }
 0x159   :  { %v2242_v40 = vmul.f32 %v1124_v3, %v1692_v26  ;;  %v1396_v3 = vsel %vm1178_vm14, 1.0, %v1606_v37  ;;  %s145_s11 = sadd.f32 %s144_s9, %s140_s3 }
 0x15b   :  { %v1136_v43 = vsel %vm1039_vm0, %v2242_v40, inf  ;;  %v1149_v12 = vsel %vm1039_vm0, %v2242_v40, -inf  ;;  %s150_s14 = sadd.f32 %s149_s12, %s145_s11 }
 0x15d   :  { %s155_s16 = sadd.f32 %s154_s15, %s150_s14 }
 0x15f   :  { %v2272_v41 = vpop.permute.xlu1 %983  ;;  %s156_s17 = smul.f32 2.0, %s155_s16 }
 0x160   :  { %v1127_v61 = vpop.f32.mrf.mxu3  ;;  %v1007_v24 = vsel %vm1001_vm2, %v2272_v41, 0.0 }
 0x161   :  { %v1133_v14 = vmul.f32 %v1127_v61, %v1692_v26 }
 0x163   :  { %v1137_v57 = vsel %vm1039_vm0, %v1133_v14, inf  ;;  %v1150_v20 = vsel %vm1039_vm0, %v1133_v14, -inf }
 0x164   :  { %v1139_v34 = vmin.f32 %v1136_v43, %v1137_v57  ;;  %v1152_v52 = vmax.f32 %v1149_v12, %v1150_v20  ;;  %v1230_v20 = vsel %vm1229_vm15, %v1695_v28, 0.0 }
 0x166   :  { %v1140_v36 = vmin.f32 %v1138_v27, %v1139_v34  ;;  %v1153_v56 = vmax.f32 %v1151_v15, %v1152_v52  ;;  %v1213_v34 = vmul.f32 %v1700_v30, %v1700_v30  ;;  %v427_v30 = vsel %vm423_vm1, %v2266_v46, 0.0 }
 0x167   :  { %v986_v61 = vpop.permute.xlu1 %985 }
 0x168   :  { %v1141_v10 = vrot.slane %v1140_v36, 4  ;;  %v1154_v19 = vrot.slane %v1153_v56, 4 }
 0x16a   :  { %v1142_v47 = vmin.f32 %v1140_v36, %v1141_v10  ;;  %v1155_v17 = vmax.f32 %v1153_v56, %v1154_v19  ;;  %v1607_v36 = vmov 7.0   ;;  %v1214_v56 = vsel %vm1039_vm0, %v1213_v34, 0.0 }
 0x16b   :  { %v424_v10 = vsel %vm423_vm1, %v2262_v29, 0.0  ;;  %v425_v19 = vsel %vm423_vm1, %v2239_v25, 0.0  ;;  %v429_v25 = vsel %vm423_vm1, %v406_v32, 0.0 }
 0x16c   :  { %v1143_v31 = vrot.slane %v1142_v47, 2  ;;  %v1156_v58 = vrot.slane %v1155_v17, 2 }
 0x16e   :  { %v1144_v45 = vmin.f32 %v1142_v47, %v1143_v31  ;;  %v1157_v23 = vmax.f32 %v1155_v17, %v1156_v58  ;;  %v1215_v47 = vrot.slane %v1214_v56, 4  ;;  %v426_v17 = vadd.f32 %v425_v19, %v424_v10 }
 0x16f   :  { %v988_v57 = vpop.permute.xlu1 %987 }
 0x170   :  { %v1145_v18 = vrot.slane %v1144_v45, 1  ;;  %v1158_v11 = vrot.slane %v1157_v23, 1  ;;  %v1011_v37 = vsel %vm1001_vm2, %v988_v57, 0.0 }
 0x172   :  { %v1146_v42 = vmin.f32 %v1144_v45, %v1145_v18  ;;  %v1159_v0 = vmax.f32 %v1157_v23, %v1158_v11  ;;  %v1003_v23 = vsel %vm1001_vm2, %v2260_v51, 0.0  ;;  %v1216_v11 = vadd.f32 %v1215_v47, %v1214_v56 }
 0x174   :  { %v1160_v22 = vsub.f32 %v1159_v0, %v1146_v42  ;;  %v1165_v6 = vsub.f32 %v1133_v14, %v1146_v42  ;;  %v1162_v59 = vsub.f32 %v2232_v1, %v1146_v42  ;;  %v1163_v55 = vsub.f32 %v2236_v48, %v1146_v42 }
 0x175   :  { %v1164_v21 = vsub.f32 %v2242_v40, %v1146_v42  ;;  %v428_v42 = vadd.f32 %v427_v30, %v426_v17  ;;  %v1217_v46 = vrot.slane %v1216_v11, 2 }
 0x176   :  { %1540 = vrcp.f32 %v1160_v22  ;;  %v1005_v22 = vsel %vm1001_vm2, %v2264_v9, 0.0 }
 0x177   :  { %1542 = vrcp.f32 %v1607_v36  ;;  %v990_v31 = vpop.permute.xlu1 %989  ;;  %v430_v2 = vadd.f32 %v429_v25, %v428_v42 }
 0x178   :  { %106 = vadd.xlane.f32.xlu2 %v105_v16  ;;  %v408_v16 = vpop.permute.xlu2 %407  ;;  %v1013_v41 = vsel %vm1001_vm2, %v990_v31, 0.0 }
 0x179   :  { %v431_v51 = vsel %vm423_vm1, %v408_v16, 0.0 }
 0x17c   :  { %v1541_v54 = vpop.eup %1540 }
 0x17d   :  { %v1166_v50 = vmul.f32 %v1541_v54, %v1162_v59  ;;  %v1167_v60 = vmul.f32 %v1541_v54, %v1163_v55  ;;  %v1168_v49 = vmul.f32 %v1541_v54, %v1164_v21  ;;  %v1169_v35 = vmul.f32 %v1541_v54, %v1165_v6  ;;  %v1543_v58 = vpop.eup %1542 }
 0x17e   :  { %v1222_v0 = vmul.f32 7.0, %v1543_v58  ;;  %v1009_v59 = vsel %vm1001_vm2, %v986_v61, 0.0 }
 0x17f   :  { %v1187_v5 = vsub.f32 %v1166_v50, %v1393_v4  ;;  %v1188_v13 = vsub.f32 %v1167_v60, %v1394_v53  ;;  %v1189_v7 = vsub.f32 %v1168_v49, %v1395_v38  ;;  %v1190_v33 = vsub.f32 %v1169_v35, %v1396_v3  ;;  %v992_v54 = vpop.permute.xlu1 %991 }
 0x180   :  { %v410_v52 = vpop.permute.xlu2 %409  ;;  %v1223_v6 = vsub.f32 1.0, %v1222_v0  ;;  %v1218_v4 = vadd.f32 %v1217_v46, %v1216_v11  ;;  %v432_v53 = vadd.f32 %v431_v51, %v430_v2  ;;  %v1015_v32 = vsel %vm1001_vm2, %v992_v54, 0.0 }
 0x181   :  { %v1191_v1 = vmul.f32 %v1187_v5, %v1187_v5  ;;  %v1192_v8 = vmul.f32 %v1188_v13, %v1188_v13  ;;  %v1193_v48 = vmul.f32 %v1189_v7, %v1189_v7  ;;  %v1194_v44 = vmul.f32 %v1190_v33, %v1190_v33 }
 0x182   :  { %v1224_v38 = vmul.f32 %v1543_v58, %v1223_v6  ;;  %v433_v3 = vsel %vm423_vm1, %v410_v52, 0.0  ;;  %v1219_v49 = vrot.slane %v1218_v4, 1  ;;  %v1610_v52 = vmov 32.0  }
 0x183   :  { %v1195_v40 = vsel %vm1039_vm0, %v1191_v1, 0.0  ;;  %v1196_v39 = vsel %vm1039_vm0, %v1192_v8, 0.0  ;;  %v1198_v12 = vsel %vm1039_vm0, %v1193_v48, 0.0  ;;  %v1200_v27 = vsel %vm1039_vm0, %v1194_v44, 0.0 }
 0x184   :  { %v1197_v43 = vadd.f32 %v1196_v39, %v1195_v40  ;;  %v434_v35 = vadd.f32 %v433_v3, %v432_v53  ;;  %v1225_v13 = vadd.f32 %v1543_v58, %v1224_v38  ;;  %vm1226_vm0 = vweird.f32 %v1543_v58 }
 0x185   :  { %v1220_v8 = vadd.f32 %v1219_v49, %v1218_v4 }
 0x186   :  { %v1199_v14 = vadd.f32 %v1198_v12, %v1197_v43  ;;  %v1227_v44 = vsel %vm1226_vm0, %v1543_v58, %v1225_v13 }
 0x187   :  { %v2309_v40 = vmul.f32 %v1227_v44, %v1220_v8 }
 0x188   :  { %v1201_v15 = vadd.f32 %v1200_v27, %v1199_v14 }
 0x189   :  { %v1249_v39 = vsel %vm1229_vm15, %v2309_v40, 0.0 }
 0x18a   :  { %1202 = vadd.xlane.f32.xlu2 %v1201_v15 }
 0x192   :  { %1231 = vadd.xlane.f32.xlu2 %v1230_v20  ;;  %v1608_v20 = vmov 56.0  }
 0x193   :  { %1544 = vrcp.f32 %v1608_v20 }
 0x199   :  { %v978_v45 = vpop.permute.xlu2 %977  ;;  %v1545_v36 = vpop.eup %1544 }
 0x19a   :  { %v1002_v18 = vsel %vm1001_vm2, %v978_v45, 0.0  ;;  %v449_v47 = vmul.f32 56.0, %v1545_v36  ;;  %vm453_vm3 = vweird.f32 %v1545_v36 }
 0x19b   :  { %v1004_v29 = vadd.f32 %v1003_v23, %v1002_v18 }
 0x19c   :  { %v450_v11 = vsub.f32 1.0, %v449_v47 }
 0x19d   :  { %v1006_v63 = vadd.f32 %v1005_v22, %v1004_v29 }
 0x19e   :  { %v451_v2 = vmul.f32 %v1545_v36, %v450_v11 }
 0x19f   :  { %v1008_v62 = vadd.f32 %v1007_v24, %v1006_v63 }
 0x1a0   :  { %v452_v54 = vadd.f32 %v1545_v36, %v451_v2 }
 0x1a1   :  { %v1010_v55 = vadd.f32 %v1009_v59, %v1008_v62  ;;  %v412_v21 = vpop.permute.xlu2 %411 }
 0x1a2   :  { %v435_v60 = vsel %vm423_vm1, %v412_v21, 0.0  ;;  %v454_v49 = vsel %vm453_vm3, %v1545_v36, %v452_v54 }
 0x1a3   :  { %v1012_v9 = vadd.f32 %v1011_v37, %v1010_v55  ;;  %v436_v7 = vadd.f32 %v435_v60, %v434_v35 }
 0x1a5   :  { %v1014_v50 = vadd.f32 %v1013_v41, %v1012_v9 }
 0x1a7   :  { %v1016_v5 = vadd.f32 %v1015_v32, %v1014_v50 }
 0x1a9   :  { %1017 = vadd.xlane.f32.xlu0 %v1016_v5  ;;  %v414_v33 = vpop.permute.xlu2 %413 }
 0x1aa   :  { %v437_v1 = vsel %vm423_vm1, %v414_v33, 0.0 }
 0x1ab   :  { %v438_v48 = vadd.f32 %v437_v1, %v436_v7 }
 0x1ad   :  { %439 = vadd.xlane.f32.xlu1 %v438_v48 }
 0x1b5   :  { %1250 = vadd.xlane.f32.xlu1 %v1249_v39 }
 0x1eb   :  { %v107_v61 = vpop.xlane.xlu2 %106 }
 0x1ec   :  { %v108_v43 = vrot.slane %v107_v61, 4 }
 0x1ee   :  { %v109_v12 = vadd.f32 %v108_v43, %v107_v61 }
 0x1f0   :  { %v110_v14 = vrot.slane %v109_v12, 2 }
 0x1f2   :  { %v111_v16 = vadd.f32 %v110_v14, %v109_v12 }
 0x1f4   :  { %v112_v27 = vrot.slane %v111_v16, 1 }
 0x1f6   :  { %v113_v15 = vadd.f32 %v112_v27, %v111_v16  ;;  %v1611_v27 = vmov 31.0  }
 0x1f8   :  { %1401 = vpush %v113_v15 }
 0x1f9   :  { %1403 = vpush %v1692_v26  ;;  %v1609_v26 = vmov 40.0  }
 0x1fa   :  { %1546 = vrcp.f32 %v1609_v26 }
 0x1fb   :  { %1548 = vrcp.f32 %v1610_v52 }
 0x1fc   :  { %1550 = vrcp.f32 %v1611_v27 }
 0x1fd   :  { %v1203_v57 = vpop.xlane.xlu2 %1202 }
 0x1fe   :  { %v1204_v19 = vrot.slane %v1203_v57, 4 }
 0x200   :  { %v1547_v56 = vpop.eup %1546  ;;  %v1205_v23 = vadd.f32 %v1204_v19, %v1203_v57 }
 0x201   :  { %v1549_v31 = vpop.eup %1548  ;;  %v1027_v30 = vmul.f32 40.0, %v1547_v56  ;;  %vm1031_vm4 = vweird.f32 %v1547_v56 }
 0x202   :  { %v1241_v29 = vmul.f32 32.0, %v1549_v31  ;;  %v1206_v24 = vrot.slane %v1205_v23, 2  ;;  %vm1245_vm5 = vweird.f32 %v1549_v31  ;;  %v1551_v15 = vpop.eup %1550 }
 0x203   :  { %v1028_v22 = vsub.f32 1.0, %v1027_v30  ;;  %v1282_v57 = vmul.f32 31.0, %v1551_v15  ;;  %vm1286_vm6 = vweird.f32 %v1551_v15 }
 0x204   :  { %v1242_v62 = vsub.f32 1.0, %v1241_v29  ;;  %v1207_v37 = vadd.f32 %v1206_v24, %v1205_v23 }
 0x205   :  { %v1232_v34 = vpop.xlane.xlu2 %1231  ;;  %v1029_v59 = vmul.f32 %v1547_v56, %v1028_v22  ;;  %v1283_v20 = vsub.f32 1.0, %v1282_v57 }
 0x206   :  { %v1233_v10 = vrot.slane %v1232_v34, 4  ;;  %v1243_v53 = vmul.f32 %v1549_v31, %v1242_v62  ;;  %v1208_v35 = vrot.slane %v1207_v37, 1 }
 0x207   :  { %v1030_v41 = vadd.f32 %v1547_v56, %v1029_v59  ;;  %v1284_v36 = vmul.f32 %v1551_v15, %v1283_v20 }
 0x208   :  { %v1234_v45 = vadd.f32 %v1233_v10, %v1232_v34  ;;  %v1244_v5 = vadd.f32 %v1549_v31, %v1243_v53  ;;  %v1209_v8 = vadd.f32 %v1208_v35, %v1207_v37 }
 0x209   :  { %v1032_v33 = vsel %vm1031_vm4, %v1547_v56, %v1030_v41  ;;  %v1285_v19 = vadd.f32 %v1551_v15, %v1284_v36 }
 0x20a   :  { %v1235_v63 = vrot.slane %v1234_v45, 2  ;;  %v1246_v44 = vsel %vm1245_vm5, %v1549_v31, %v1244_v5 }
 0x20b   :  { %v1287_v31 = vsel %vm1286_vm6, %v1551_v15, %v1285_v19 }
 0x20c   :  { %v1236_v55 = vadd.f32 %v1235_v63, %v1234_v45 }
 0x20e   :  { %v1237_v32 = vrot.slane %v1236_v55, 1 }
 0x210   :  { %v1238_v1 = vadd.f32 %v1237_v32, %v1236_v55 }
 0x21c   :  { %v1018_v17 = vpop.xlane.xlu0 %1017 }
 0x21d   :  { %v1019_v58 = vrot.slane %v1018_v17, 4 }
 0x21f   :  { %v1020_v18 = vadd.f32 %v1019_v58, %v1018_v17 }
 0x220   :  { %v440_v42 = vpop.xlane.xlu1 %439 }
 0x221   :  { %v1021_v0 = vrot.slane %v1020_v18, 2  ;;  %v441_v25 = vrot.slane %v440_v42, 4 }
 0x223   :  { %v442_v46 = vadd.f32 %v441_v25, %v440_v42  ;;  %v1022_v6 = vadd.f32 %v1021_v0, %v1020_v18 }
 0x225   :  { %v443_v51 = vrot.slane %v442_v46, 2  ;;  %v1023_v3 = vrot.slane %v1022_v6, 1 }
 0x227   :  { %v444_v21 = vadd.f32 %v443_v51, %v442_v46  ;;  %v1024_v7 = vadd.f32 %v1023_v3, %v1022_v6 }
 0x228   :  { %v1251_v4 = vpop.xlane.xlu1 %1250 }
 0x229   :  { %v1252_v9 = vrot.slane %v1251_v4, 4  ;;  %v445_v38 = vrot.slane %v444_v21, 1  ;;  %s1402_s18 = spop %1401 }
 0x22a   :  { %s115_s19 = smul.f32 0.0078125, %s1402_s18  ;;  %s1404_s20 = spop %1403 }
 0x22b   :  { %v1253_v50 = vadd.f32 %v1252_v9, %v1251_v4  ;;  %v446_v60 = vadd.f32 %v445_v38, %v444_v21  ;;  %s165_s21 = smul.f32 %s1404_s20, %s156_s17  ;;  %s1347_s18 = sshll.u32 %s2343_s5, 4  ;;  %s1348_s18 = int_to_ptr.vmem [resolvable:$true] %s1347_s18 }
 0x22c   :  { %1333 = sst [smem:[#allocation7 + $0x1]] %s115_s19 }
 0x22d   :  { %v1254_v13 = vrot.slane %v1253_v50, 2  ;;  %1405 = vpush %v446_v60  ;;  %s166_s22 = sadd.f32 %s165_s21, %s115_s19 }
 0x22e   :  { %1407 = vpush %v454_v49  ;;  %1335 = sst [smem:[#allocation7 + $0x2]] %s165_s21  ;;  %s1612_s21 = smov [#allocation7]  }
 0x22f   :  { %1409 = vpush %v1024_v7  ;;  %v1255_v48 = vadd.f32 %v1254_v13, %v1253_v50 }
 0x230   :  { %1411 = vpush %v1032_v33 }
 0x231   :  { %1413 = vpush %v1209_v8  ;;  %v1256_v39 = vrot.slane %v1255_v48, 1 }
 0x232   :  { %1415 = vpush %v1238_v1 }
 0x233   :  { %1417 = vpush %v1246_v44  ;;  %v1257_v61 = vadd.f32 %v1256_v39, %v1255_v48 }
 0x235   :  { %1419 = vpush %v1257_v61 }
 0x25e   :  { %s1406_s23 = spop %1405 }
 0x25f   :  { %s1408_s24 = spop %1407 }
 0x260   :  { %s456_s25 = smul.f32 %s1408_s24, %s1406_s23  ;;  %s1410_s26 = spop %1409 }
 0x261   :  { %s1412_s27 = spop %1411 }
 0x262   :  { %s1034_s0 = smul.f32 %s1412_s27, %s1410_s26  ;;  %s1414_s28 = spop %1413 }
 0x263   :  { %s1211_s1 = smul.f32 0.01, %s1414_s28  ;;  %s2317_s29 = spop %1415 }
 0x264   :  { %s1035_s30 = sadd.f32 %s1034_s0, %s456_s25  ;;  %s2319_s4 = spop %1417 }
 0x265   :  { %1339 = sst [smem:[#allocation7 + $0x4]] %s1211_s1  ;;  %s1248_s2 = smul.f32 %s2319_s4, %s2317_s29 }
 0x266   :  { %s1036_s6 = smul.f32 0.1, %s1035_s30  ;;  %s1420_s7 = spop %1419 }
 0x267   :  { %s1267_s8 = smul.f32 %s1420_s7, %s2319_s4  ;;  %v1308_v63 = vstv %s1248_s2 }
 0x268   :  { %1337 = sst [smem:[#allocation7 + $0x3]] %s1036_s6  ;;  %v1309_v24 = vsub.f32 %v1695_v28, %v1308_v63 }
 0x269   :  { %s1037_s3 = sadd.f32 %s1036_s6, %s166_s22  ;;  %v1268_v43 = vstv %s1267_s8 }
 0x26a   :  { %v1269_v12 = vsub.f32 %v2309_v40, %v1268_v43  ;;  %v1310_v2 = vmul.f32 %v1309_v24, %v1309_v24 }
 0x26b   :  { %s2325_s9 = sadd.f32 %s1211_s1, %s1037_s3 }
 0x26c   :  { %v1270_v14 = vmul.f32 %v1269_v12, %v1269_v12 }
 0x26e   :  { %v1271_v16 = vsel %vm1229_vm15, %v1270_v14, 0.0 }
 0x26f   :  { %1272 = vadd.xlane.f32.xlu2 %v1271_v16 }
 0x2e2   :  { %v1273_v26 = vpop.xlane.xlu2 %1272 }
 0x2e3   :  { %v1274_v34 = vrot.slane %v1273_v26, 4 }
 0x2e5   :  { %v1275_v52 = vadd.f32 %v1274_v34, %v1273_v26 }
 0x2e7   :  { %v1276_v56 = vrot.slane %v1275_v52, 2 }
 0x2e9   :  { %v1277_v10 = vadd.f32 %v1276_v56, %v1275_v52 }
 0x2eb   :  { %v1278_v47 = vrot.slane %v1277_v10, 1 }
 0x2ed   :  { %v1279_v17 = vadd.f32 %v1278_v47, %v1277_v10 }
 0x2ef   :  { %1421 = vpush %v1279_v17 }
 0x2f0   :  { %1423 = vpush %v1287_v31 }
 0x320   :  { %s1422_s10 = spop %1421 }
 0x321   :  { %s1424_s11 = spop %1423 }
 0x322   :  { %s1289_s12 = smul.f32 %s1424_s11, %s1422_s10 }
 0x324   :  { %v1290_v58 = vstv %s1289_s12 }
 0x325   :  { %1552 = vrcp.f32 %v1290_v58  ;;  %v1302_v18 = vand.u32 2147483648, %v1290_v58  ;;  %v1300_v42 = vand.u32 2147483647, %v1290_v58  ;;  %vm1296_vm9 = vweird.f32 %v1290_v58 }
 0x327   :  { %v1303_v0 = vor.u32 1.1754944e-38, %v1302_v18  ;;  %vm1301_vm11 = vcmp.eq.f32.partialorder %v1300_v42, 8.507059e+37 }
 0x32b   :  { %v1553_v30 = vpop.eup %1552 }
 0x32c   :  { %v1292_v45 = vmul.f32 %v1553_v30, %v1290_v58  ;;  %vm1297_vm7 = vweird.f32 %v1553_v30 }
 0x32d   :  { %vm1298_vm10 = vmor %vm1296_vm9, %vm1297_vm7 }
 0x32e   :  { %v1293_v23 = vsub.f32 1.0, %v1292_v45 }
 0x330   :  { %v1294_v11 = vmul.f32 %v1553_v30, %v1293_v23 }
 0x332   :  { %v1295_v29 = vadd.f32 %v1553_v30, %v1294_v11 }
 0x334   :  { %v1299_v25 = vsel %vm1298_vm10, %v1553_v30, %v1295_v29 }
 0x335   :  { %v1304_v22 = vsel %vm1301_vm11, %v1303_v0, %v1299_v25 }
 0x336   :  { %1425 = vpush %v1304_v22 }
 0x367   :  { %s1426_s13 = spop %1425 }
 0x368   :  { %v1306_v46 = vstv %s1426_s13 }
 0x369   :  { %v1307_v62 = vmul.f32 %v1306_v46, %v2309_v40  ;;  %v1311_v6 = vmul.f32 %v1310_v2, %v1306_v46 }
 0x36b   :  { %1554 = vlog2.f32 %v1307_v62  ;;  %v1312_v51 = vadd.f32 %v1311_v6, %v1307_v62 }
 0x36d   :  { %v1397_v55 = vadd.f32 -1.0, %v1312_v51 }
 0x371   :  { %v1555_v59 = vpop.eup %1554 }
 0x372   :  { %v1315_v21 = vmul.f32 0.6931472, %v1555_v59 }
 0x374   :  { %v1316_v54 = vsub.f32 %v1397_v55, %v1315_v21 }
 0x376   :  { %v1317_v37 = vsel %vm1229_vm15, %v1316_v54, 0.0 }
 0x377   :  { %1318 = vadd.xlane.f32.xlu1 %v1317_v37 }
 0x3ea   :  { %v1319_v4 = vpop.xlane.xlu1 %1318 }
 0x3eb   :  { %v1320_v53 = vrot.slane %v1319_v4, 4 }
 0x3ed   :  { %v1321_v9 = vadd.f32 %v1320_v53, %v1319_v4 }
 0x3ef   :  { %v1322_v28 = vrot.slane %v1321_v9, 2 }
 0x3f1   :  { %v1323_v38 = vadd.f32 %v1322_v28, %v1321_v9 }
 0x3f3   :  { %v1324_v3 = vrot.slane %v1323_v38, 1 }
 0x3f5   :  { %v1325_v41 = vadd.f32 %v1324_v3, %v1323_v38 }
 0x3f7   :  { %1427 = vpush %v1325_v41 }
 0x428   :  { %s1428_s14 = spop %1427 }
 0x429   :  { %s1327_s15 = smul.f32 0.5, %s1428_s14 }
 0x42b   :  { %s1328_s19 = smul.f32 0.005, %s1327_s15 }
 0x42d   :  { %s1329_s20 = sadd.f32 %s1328_s19, %s2325_s9 }
 0x42e   :  { %1341 = sst [smem:[#allocation7 + $0x5]] %s1328_s19 }
 0x42f   :  { %1331 = sst [smem:[#allocation7]] %s1329_s20 }
 0x430   :  { %1350 = dma.smem_to_vmem %s1612_s21, 16, %s1348_s18, [#allocation4]  }
 0x431   :  { %1598 = dma.done.wait [#allocation4], 16  }
 0x432   :  { %1599 = vsyncadd [#allocation4], 4294967280 }
 0x433   :  { %1355 = sfence }
 0x434   :  { %1356 = vsyncpa [#allocation3], 1 }
 0x435   :  { %1357 = vsyncpa [#allocation6], 1 }
 0x436   :  { %1358 = vsyncpa [#allocation4], 1 }

</bundles_post_ra>
